<compile_context>
chip_gen: v6e
topology: v6e:2x2x1
jax: 0.10.0
libtpu: 0.0.40
codegen_flags: <defaults>
</compile_context>

<pallas_src>
import jax
import jax.numpy as jnp
import numpy as np
from jax.experimental import pallas as pl
from jax.experimental.pallas import tpu as pltpu

_LN_EPS = 1e-5                      # torch.nn.LayerNorm default
_INV_SQRT2 = 0.7071067811865476


# ----------------------------------------------------------------------------- kernel helpers
def _layernorm_rows(x, gamma, beta):
    """LayerNorm over the channel (sublane) axis of a (C, S) tile; gamma/beta are (C, 1)."""
    mu = jnp.mean(x, axis=0, keepdims=True)
    xc = x - mu
    var = jnp.mean(xc * xc, axis=0, keepdims=True)
    return xc * jax.lax.rsqrt(var + _LN_EPS) * gamma + beta


def _erf(z):
    # Abramowitz & Stegun 7.1.26 (|err| <= 1.5e-7): exp goes to the EUP, rest is a short VPU chain.
    az = jnp.abs(z)
    t = 1.0 / (1.0 + 0.3275911 * az)
    poly = t * (0.254829592 + t * (-0.284496736 + t * (1.421413741
                + t * (-1.453152027 + t * 1.061405429))))
    e = 1.0 - poly * jnp.exp(-az * az)
    return jnp.where(z < 0.0, -e, e)


def _gelu(x):
    # Matches PyTorch nn.GELU() (exact erf form) to ~1e-7.
    return 0.5 * x * (1.0 + _erf(x * _INV_SQRT2))


# ----------------------------------------------------------------------------- the Pallas kernel
def _block_spect_kernel(x_ref, g1_ref, b1_ref, frt_ref, fit_ref, wr_ref, wi_ref,
                        mrt_ref, mit_ref, g2_ref, b2_ref, w1t_ref, c1_ref, w2t_ref, c2_ref,
                        o_ref):
    # x_ref / o_ref : (bblk, C, S) f32, channel-first per image (S = H*W, lane-dense last dim)
    # frt/fit       : (S, F) f32   forward rDFT factors (shared across channels), F = H*(W//2+1)
    # wr/wi         : (C, F) f32   spectral gate (real/imag) per (channel, freq)
    # mrt/mit       : (F, S) f32   inverse rDFT factors
    # w1t/(c1)      : (hid, C) bf16 / (hid, 1) f32 ;  w2t/(c2): (C, hid) bf16 / (C, 1) f32
    bblk = x_ref.shape[0]

    # Hoist shared weight loads out of the per-image loop.
    g1, b1 = g1_ref[...], b1_ref[...]
    g2, b2 = g2_ref[...], b2_ref[...]
    frt, fit = frt_ref[...], fit_ref[...]
    wr, wi = wr_ref[...], wi_ref[...]
    mrt, mit = mrt_ref[...], mit_ref[...]
    w1t, c1 = w1t_ref[...], c1_ref[...]
    w2t, c2 = w2t_ref[...], c2_ref[...]

    for b in range(bblk):                                   # static, small -> unrolled
        xb = x_ref[b]                                       # (C, S) f32

        # --- norm1 (over channels) ---
        t = _layernorm_rows(xb, g1, b1)

        # --- SpectralGatingNetwork: shared rDFT factors + per-channel complex gate ---
        zr = jnp.dot(t, frt, preferred_element_type=jnp.float32)   # (C, F) = Re(rfft2)
        zi = jnp.dot(t, fit, preferred_element_type=jnp.float32)   # (C, F) = Im(rfft2)
        yr = zr * wr - zi * wi                                     # complex gate (VPU)
        yi = zr * wi + zi * wr
        y = (jnp.dot(yr, mrt, preferred_element_type=jnp.float32) +
             jnp.dot(yi, mit, preferred_element_type=jnp.float32))  # (C, S) = irfft2

        # --- norm2 ---
        t2 = _layernorm_rows(y, g2, b2)

        # --- MLP: fc1 -> GELU(erf) -> fc2 ; bf16 MXU operands, f32 accumulate/elementwise ---
        h = jnp.dot(w1t, t2.astype(jnp.bfloat16),
                    preferred_element_type=jnp.float32) + c1        # (hid, S)
        h = _gelu(h)
        ob = jnp.dot(w2t, h.astype(jnp.bfloat16),
                     preferred_element_type=jnp.float32) + c2       # (C, S)

        # --- residual (dropout p=0 and DropPath are identity) ---
        o_ref[b] = xb + ob


# ----------------------------------------------------------------------------- parameter folding
def build_dft_factors(H, W):
    """Fold rfft2(ortho) / irfft2(s=(H,H), ortho) into channel-shared real factor matrices.

    Returns fr_t, fi_t (S, F) with  Re/Im(rfft2(x)).flat = x.flat @ fr_t / fi_t
    and     mr_t, mi_t (F, S) with  irfft2(Y).flat = Re(Y).flat @ mr_t + Im(Y).flat @ mi_t.
    """
    # TODO(synk): Mosaic has no FFT primitive, so the FFT pair is folded into these dense factor
    # matrices at parameter-prep time (exact, input-independent); per-input compute stays in-kernel.
    assert H == W, "SpectralGatingNetwork with s=(h, h) requires square spatial input"
    S = H * W
    Wr = W // 2 + 1
    F = H * Wr
    eye_s = np.eye(S, dtype=np.float32).reshape(S, H, W)
    fwd = np.fft.rfft2(eye_s, axes=(1, 2), norm="ortho").reshape(S, F)
    fr_t = np.real(fwd).astype(np.float32)
    fi_t = np.imag(fwd).astype(np.float32)
    eye_f = np.eye(F, dtype=np.complex64).reshape(F, H, Wr)
    mr_t = np.fft.irfft2(eye_f, s=(H, H), axes=(1, 2), norm="ortho").reshape(F, S).astype(np.float32)
    mi_t = np.fft.irfft2(1j * eye_f, s=(H, H), axes=(1, 2), norm="ortho").reshape(F, S).astype(np.float32)
    return fr_t, fi_t, mr_t, mi_t


def prepare_block_spect(params, H, W):
    """One-time (per parameter set) preprocessing, hoisted out of the forward path."""
    cw = np.asarray(params["complex_weight"])             # (H, W//2+1, C, 2)
    C = cw.shape[2]
    hid = params["fc1_w"].shape[1]
    F = H * (W // 2 + 1)

    fr_t, fi_t, mr_t, mi_t = build_dft_factors(H, W)      # f32 (review: keep DFT factors in f32)
    w = cw[..., 0] + 1j * cw[..., 1]                       # (H, Wr, C)
    wflat = np.transpose(w, (2, 0, 1)).reshape(C, F)       # (C, F), freq flattened row-major

    return {
        "fr_t": jnp.asarray(fr_t), "fi_t": jnp.asarray(fi_t),
        "mr_t": jnp.asarray(mr_t), "mi_t": jnp.asarray(mi_t),
        "wr": jnp.asarray(np.real(wflat).astype(np.float32)),
        "wi": jnp.asarray(np.imag(wflat).astype(np.float32)),
        "ln1_g": jnp.asarray(params["ln1_g"]).reshape(C, 1).astype(jnp.float32),
        "ln1_b": jnp.asarray(params["ln1_b"]).reshape(C, 1).astype(jnp.float32),
        "ln2_g": jnp.asarray(params["ln2_g"]).reshape(C, 1).astype(jnp.float32),
        "ln2_b": jnp.asarray(params["ln2_b"]).reshape(C, 1).astype(jnp.float32),
        "w1t": jnp.asarray(params["fc1_w"]).T.astype(jnp.bfloat16),   # (hid, C)
        "b1": jnp.asarray(params["fc1_b"]).reshape(hid, 1).astype(jnp.float32),
        "w2t": jnp.asarray(params["fc2_w"]).T.astype(jnp.bfloat16),   # (C, hid)
        "b2": jnp.asarray(params["fc2_b"]).reshape(C, 1).astype(jnp.float32),
    }


# ----------------------------------------------------------------------------- sizing heuristics
def _num_tensorcores():
    """v7x packs 2 TensorCores per chip; v5e/v6e have 1. Safe fallback to 1 if unknown."""
    try:
        kind = jax.devices()[0].device_kind.lower()
    except Exception:
        return 1
    return 2 if ("v7" in kind or "7x" in kind) else 1


def _choose_block_batch(B, S, rows_target=512):
    """Images per grid step. Single-TC chips: just grow M toward rows_target (amortize the
    ~0.35us/step grid overhead). Multi-TC chips (v7x): additionally keep >= num_cores grid steps."""
    bblk = max(1, min(B, rows_target // max(1, S)))
    while bblk > 1 and B % bblk != 0:
        bblk -= 1
    ncores = _num_tensorcores()
    if ncores > 1 and B >= ncores and B // bblk < ncores:
        bblk = max(1, B // ncores)
        while bblk > 1 and B % bblk != 0:
            bblk -= 1
    return bblk


def _vmem_limit_bytes(bblk, S, C, F, hid):
    """Explicit VMEM budget: double-buffered I/O blocks + resident weights + live intermediates,
    with headroom, capped at v7x's 64 MiB physical VMEM (smallest across generations)."""
    io_blk = bblk * C * S * 4
    weights = (4 * S * F + 2 * C * F + 2 * hid + 6 * C) * 4 + 2 * hid * C * 2
    live = (4 * C * S + 4 * C * F + 2 * hid * S) * 4
    need = 2 * 2 * io_blk + weights + live
    return int(min(max(4 * need, 16 << 20), 64 << 20))


# ----------------------------------------------------------------------------- wrapper
def block_spect_forward(x_nchw, prep):
    B, C, H, W = x_nchw.shape
    assert H == W
    S = H * W
    F = prep["fr_t"].shape[1]
    hid = prep["w1t"].shape[0]
    bblk = _choose_block_batch(B, S)

    # NCHW -> (B, C, S) is a free reshape (no HBM transpose pass); kernel works channel-first.
    x_cs = x_nchw.reshape(B, C, S).astype(jnp.float32)

    out = pl.pallas_call(
        _block_spect_kernel,
        out_shape=jax.ShapeDtypeStruct((B, C, S), jnp.float32),
        grid=(B // bblk,),
        in_specs=[
            pl.BlockSpec((bblk, C, S), lambda i: (i, 0, 0)),     # x block (channel-first)
            pl.BlockSpec((C, 1), lambda i: (0, 0)),              # norm1 gamma
            pl.BlockSpec((C, 1), lambda i: (0, 0)),              # norm1 beta
            pl.BlockSpec((S, F), lambda i: (0, 0)),              # forward rDFT (real), f32
            pl.BlockSpec((S, F), lambda i: (0, 0)),              # forward rDFT (imag), f32
            pl.BlockSpec((C, F), lambda i: (0, 0)),              # gate real
            pl.BlockSpec((C, F), lambda i: (0, 0)),              # gate imag
            pl.BlockSpec((F, S), lambda i: (0, 0)),              # inverse rDFT (real), f32
            pl.BlockSpec((F, S), lambda i: (0, 0)),              # inverse rDFT (imag), f32
            pl.BlockSpec((C, 1), lambda i: (0, 0)),              # norm2 gamma
            pl.BlockSpec((C, 1), lambda i: (0, 0)),              # norm2 beta
            pl.BlockSpec((hid, C), lambda i: (0, 0)),            # fc1 weight^T, bf16
            pl.BlockSpec((hid, 1), lambda i: (0, 0)),            # fc1 bias
            pl.BlockSpec((C, hid), lambda i: (0, 0)),            # fc2 weight^T, bf16
            pl.BlockSpec((C, 1), lambda i: (0, 0)),              # fc2 bias
        ],
        out_specs=pl.BlockSpec((bblk, C, S), lambda i: (i, 0, 0)),
        compiler_params=pltpu.CompilerParams(
            dimension_semantics=("parallel",),
            vmem_limit_bytes=_vmem_limit_bytes(bblk, S, C, F, hid)),
    )(x_cs, prep["ln1_g"], prep["ln1_b"], prep["fr_t"], prep["fi_t"], prep["wr"], prep["wi"],
      prep["mr_t"], prep["mi_t"], prep["ln2_g"], prep["ln2_b"],
      prep["w1t"], prep["b1"], prep["w2t"], prep["b2"])

    return out.reshape(B, C, H, W)                               # free reshape back to NCHW


# ----------------------------------------------------------------------------- pure-JAX reference
def block_spect_reference(x_nchw, params):
    B, C, H, W = x_nchw.shape
    x = jnp.transpose(x_nchw, (0, 2, 3, 1)).astype(jnp.float32)          # (B,H,W,C)

    def ln(v, g, b):
        mu = jnp.mean(v, axis=-1, keepdims=True)
        var = jnp.mean((v - mu) ** 2, axis=-1, keepdims=True)
        return (v - mu) / jnp.sqrt(var + _LN_EPS) * g + b

    t = ln(x, params["ln1_g"], params["ln1_b"])
    w = params["complex_weight"][..., 0] + 1j * params["complex_weight"][..., 1]
    X = jnp.fft.rfft2(t, axes=(1, 2), norm="ortho")
    t = jnp.fft.irfft2(X * w[None], s=(H, H), axes=(1, 2), norm="ortho")
    t = ln(t, params["ln2_g"], params["ln2_b"])
    h = jnp.einsum("bhwc,cd->bhwd", t, params["fc1_w"], precision="highest") + params["fc1_b"]
    h = 0.5 * h * (1.0 + jax.scipy.special.erf(h * _INV_SQRT2))          # exact erf-GELU
    o = jnp.einsum("bhwd,dc->bhwc", h, params["fc2_w"], precision="highest") + params["fc2_b"]
    return jnp.transpose(x + o, (0, 3, 1, 2))


# ----------------------------------------------------------------------------- deterministic init
def init_params(key, dim, H, W, mlp_ratio=4.0):
    Wc = W // 2 + 1
    hid = int(dim * mlp_ratio)
    ks = jax.random.split(key, 9)
    return {
        "ln1_g": 1.0 + 0.05 * jax.random.normal(ks[0], (dim,), jnp.float32),
        "ln1_b": 0.05 * jax.random.normal(ks[1], (dim,), jnp.float32),
        "ln2_g": 1.0 + 0.05 * jax.random.normal(ks[2], (dim,), jnp.float32),
        "ln2_b": 0.05 * jax.random.normal(ks[3], (dim,), jnp.float32),
        # SpectralGatingNetwork.complex_weight: (h, w, dim, 2) * 0.02
        "complex_weight": 0.02 * jax.random.normal(ks[4], (H, Wc, dim, 2), jnp.float32),
        # Mlp: fc1 (dim -> hid), fc2 (hid -> dim); stored as (in, out)
        "fc1_w": jax.random.normal(ks[5], (dim, hid), jnp.float32) / np.sqrt(dim),
        "fc1_b": 0.01 * jax.random.normal(ks[6], (hid,), jnp.float32),
        "fc2_w": jax.random.normal(ks[7], (hid, dim), jnp.float32) / np.sqrt(hid),
        "fc2_b": 0.01 * jax.random.normal(ks[8], (dim,), jnp.float32),
    }


if __name__ == "__main__":
    # Block_spect(dim=8, h=8, w=8//2+1=5) applied to NCHW input (B=2, C=8, H=W=8)
    B, dim, H, W = 2, 8, 8, 8
    key = jax.random.PRNGKey(0)
    kx, kp = jax.random.split(key)
    x = jax.random.normal(kx, (B, dim, H, W), dtype=jnp.float32)
    params = init_params(kp, dim, H, W)

    # One-time parameter preprocessing (DFT-factor folding etc.) — NOT part of the forward path.
    prep = prepare_block_spect(params, H, W)
    fwd = jax.jit(block_spect_forward)

    out = jax.block_until_ready(fwd(x, prep))
    ref = jax.block_until_ready(block_spect_reference(x, params))

    assert out.shape == (B, dim, H, W)
    # Error budget: bf16 MLP weights/activations on the MXU; the spectral path is f32 and GELU is
    # near-exact, so this tolerance is conservative.
    np.testing.assert_allclose(np.asarray(out), np.asarray(ref), rtol=2e-2, atol=5e-2)
    print("KERNEL_OK")
</pallas_src>

<mosaic_0001>
module attributes {stable_mosaic.version = 11 : i64} {
  func.func @_block_spect_kernel(%arg0: i32, %arg1: memref<2x8x64xf32, #tpu.memory_space<vmem>>, %arg2: memref<8x1xf32, #tpu.memory_space<vmem>>, %arg3: memref<8x1xf32, #tpu.memory_space<vmem>>, %arg4: memref<64x40xf32, #tpu.memory_space<vmem>>, %arg5: memref<64x40xf32, #tpu.memory_space<vmem>>, %arg6: memref<8x40xf32, #tpu.memory_space<vmem>>, %arg7: memref<8x40xf32, #tpu.memory_space<vmem>>, %arg8: memref<40x64xf32, #tpu.memory_space<vmem>>, %arg9: memref<40x64xf32, #tpu.memory_space<vmem>>, %arg10: memref<8x1xf32, #tpu.memory_space<vmem>>, %arg11: memref<8x1xf32, #tpu.memory_space<vmem>>, %arg12: memref<32x8xbf16, #tpu.memory_space<vmem>>, %arg13: memref<32x1xf32, #tpu.memory_space<vmem>>, %arg14: memref<8x32xbf16, #tpu.memory_space<vmem>>, %arg15: memref<8x1xf32, #tpu.memory_space<vmem>>, %arg16: memref<2x8x64xf32, #tpu.memory_space<vmem>>) attributes {dimension_semantics = [#tpu.dimension_semantics<parallel>], iteration_bounds = array<i64: 1>, scalar_prefetch = 0 : i64, scratch_operands = 0 : i64, tpu.core_type = #tpu.core_type<tc>, window_params = [{transform_indices = @transform_0, window_bounds = array<i64: 2, 8, 64>}, {pipeline_mode = #tpu.pipeline_mode<synchronous>, transform_indices = @transform_1, window_bounds = array<i64: 8, 1>}, {pipeline_mode = #tpu.pipeline_mode<synchronous>, transform_indices = @transform_2, window_bounds = array<i64: 8, 1>}, {pipeline_mode = #tpu.pipeline_mode<synchronous>, transform_indices = @transform_3, window_bounds = array<i64: 64, 40>}, {pipeline_mode = #tpu.pipeline_mode<synchronous>, transform_indices = @transform_4, window_bounds = array<i64: 64, 40>}, {pipeline_mode = #tpu.pipeline_mode<synchronous>, transform_indices = @transform_5, window_bounds = array<i64: 8, 40>}, {pipeline_mode = #tpu.pipeline_mode<synchronous>, transform_indices = @transform_6, window_bounds = array<i64: 8, 40>}, {pipeline_mode = #tpu.pipeline_mode<synchronous>, transform_indices = @transform_7, window_bounds = array<i64: 40, 64>}, {pipeline_mode = #tpu.pipeline_mode<synchronous>, transform_indices = @transform_8, window_bounds = array<i64: 40, 64>}, {pipeline_mode = #tpu.pipeline_mode<synchronous>, transform_indices = @transform_9, window_bounds = array<i64: 8, 1>}, {pipeline_mode = #tpu.pipeline_mode<synchronous>, transform_indices = @transform_10, window_bounds = array<i64: 8, 1>}, {pipeline_mode = #tpu.pipeline_mode<synchronous>, transform_indices = @transform_11, window_bounds = array<i64: 32, 8>}, {pipeline_mode = #tpu.pipeline_mode<synchronous>, transform_indices = @transform_12, window_bounds = array<i64: 32, 1>}, {pipeline_mode = #tpu.pipeline_mode<synchronous>, transform_indices = @transform_13, window_bounds = array<i64: 8, 32>}, {pipeline_mode = #tpu.pipeline_mode<synchronous>, transform_indices = @transform_14, window_bounds = array<i64: 8, 1>}, {transform_indices = @transform_15, window_bounds = array<i64: 2, 8, 64>}]} {
    %c0 = arith.constant 0 : index
    %c0_0 = arith.constant 0 : index
    %0 = vector.load %arg2[%c0, %c0_0] : memref<8x1xf32, #tpu.memory_space<vmem>>, vector<8x1xf32>
    %c0_1 = arith.constant 0 : index
    %c0_2 = arith.constant 0 : index
    %1 = vector.load %arg3[%c0_1, %c0_2] : memref<8x1xf32, #tpu.memory_space<vmem>>, vector<8x1xf32>
    %c0_3 = arith.constant 0 : index
    %c0_4 = arith.constant 0 : index
    %2 = vector.load %arg10[%c0_3, %c0_4] : memref<8x1xf32, #tpu.memory_space<vmem>>, vector<8x1xf32>
    %c0_5 = arith.constant 0 : index
    %c0_6 = arith.constant 0 : index
    %3 = vector.load %arg11[%c0_5, %c0_6] : memref<8x1xf32, #tpu.memory_space<vmem>>, vector<8x1xf32>
    %c0_7 = arith.constant 0 : index
    %c0_8 = arith.constant 0 : index
    %4 = vector.load %arg4[%c0_7, %c0_8] : memref<64x40xf32, #tpu.memory_space<vmem>>, vector<64x40xf32>
    %c0_9 = arith.constant 0 : index
    %c0_10 = arith.constant 0 : index
    %5 = vector.load %arg5[%c0_9, %c0_10] : memref<64x40xf32, #tpu.memory_space<vmem>>, vector<64x40xf32>
    %c0_11 = arith.constant 0 : index
    %c0_12 = arith.constant 0 : index
    %6 = vector.load %arg6[%c0_11, %c0_12] : memref<8x40xf32, #tpu.memory_space<vmem>>, vector<8x40xf32>
    %c0_13 = arith.constant 0 : index
    %c0_14 = arith.constant 0 : index
    %7 = vector.load %arg7[%c0_13, %c0_14] : memref<8x40xf32, #tpu.memory_space<vmem>>, vector<8x40xf32>
    %c0_15 = arith.constant 0 : index
    %c0_16 = arith.constant 0 : index
    %8 = vector.load %arg8[%c0_15, %c0_16] : memref<40x64xf32, #tpu.memory_space<vmem>>, vector<40x64xf32>
    %c0_17 = arith.constant 0 : index
    %c0_18 = arith.constant 0 : index
    %9 = vector.load %arg9[%c0_17, %c0_18] : memref<40x64xf32, #tpu.memory_space<vmem>>, vector<40x64xf32>
    %c0_19 = arith.constant 0 : index
    %c0_20 = arith.constant 0 : index
    %10 = vector.load %arg12[%c0_19, %c0_20] : memref<32x8xbf16, #tpu.memory_space<vmem>>, vector<32x8xbf16>
    %c0_21 = arith.constant 0 : index
    %c0_22 = arith.constant 0 : index
    %11 = vector.load %arg13[%c0_21, %c0_22] : memref<32x1xf32, #tpu.memory_space<vmem>>, vector<32x1xf32>
    %c0_23 = arith.constant 0 : index
    %c0_24 = arith.constant 0 : index
    %12 = vector.load %arg14[%c0_23, %c0_24] : memref<8x32xbf16, #tpu.memory_space<vmem>>, vector<8x32xbf16>
    %c0_25 = arith.constant 0 : index
    %c0_26 = arith.constant 0 : index
    %13 = vector.load %arg15[%c0_25, %c0_26] : memref<8x1xf32, #tpu.memory_space<vmem>>, vector<8x1xf32>
    %c0_27 = arith.constant 0 : index
    %c0_28 = arith.constant 0 : index
    %c0_29 = arith.constant 0 : index
    %14 = vector.load %arg1[%c0_27, %c0_28, %c0_29] : memref<2x8x64xf32, #tpu.memory_space<vmem>>, vector<1x8x64xf32>
    %15 = vector.shape_cast %14 : vector<1x8x64xf32> to vector<8x64xf32>
    %cst = arith.constant dense<0.000000e+00> : vector<64xf32>
    %16 = vector.multi_reduction <add>, %15, %cst [0] : vector<8x64xf32> to vector<64xf32>
    %17 = vector.shape_cast %16 : vector<64xf32> to vector<1x64xf32>
    %cst_30 = arith.constant 8.000000e+00 : f32
    %18 = vector.broadcast %cst_30 : f32 to vector<1x64xf32>
    %19 = arith.divf %17, %18 : vector<1x64xf32>
    %20 = vector.broadcast %19 : vector<1x64xf32> to vector<8x64xf32>
    %21 = arith.subf %15, %20 : vector<8x64xf32>
    %22 = arith.mulf %21, %21 : vector<8x64xf32>
    %cst_31 = arith.constant dense<0.000000e+00> : vector<64xf32>
    %23 = vector.multi_reduction <add>, %22, %cst_31 [0] : vector<8x64xf32> to vector<64xf32>
    %24 = vector.shape_cast %23 : vector<64xf32> to vector<1x64xf32>
    %cst_32 = arith.constant 8.000000e+00 : f32
    %25 = vector.broadcast %cst_32 : f32 to vector<1x64xf32>
    %26 = arith.divf %24, %25 : vector<1x64xf32>
    %cst_33 = arith.constant 9.99999974E-6 : f32
    %27 = vector.broadcast %cst_33 : f32 to vector<1x64xf32>
    %28 = arith.addf %26, %27 : vector<1x64xf32>
    %29 = math.rsqrt %28 : vector<1x64xf32>
    %30 = vector.broadcast %29 : vector<1x64xf32> to vector<8x64xf32>
    %31 = arith.mulf %21, %30 : vector<8x64xf32>
    %32 = vector.broadcast %0 : vector<8x1xf32> to vector<8x64xf32>
    %33 = arith.mulf %31, %32 : vector<8x64xf32>
    %34 = vector.broadcast %1 : vector<8x1xf32> to vector<8x64xf32>
    %35 = arith.addf %33, %34 : vector<8x64xf32>
    %cst_34 = arith.constant dense<0.000000e+00> : vector<8x40xf32>
    %36 = tpu.matmul %35, %4, %cst_34 {dimension_numbers = #tpu.dot_dimension_numbers<[1], [0], [0], [1], [0, 0, 1, 1], [], []>} : vector<8x64xf32>, vector<64x40xf32>, vector<8x40xf32> -> vector<8x40xf32>
    %cst_35 = arith.constant dense<0.000000e+00> : vector<8x40xf32>
    %37 = tpu.matmul %35, %5, %cst_35 {dimension_numbers = #tpu.dot_dimension_numbers<[1], [0], [0], [1], [0, 0, 1, 1], [], []>} : vector<8x64xf32>, vector<64x40xf32>, vector<8x40xf32> -> vector<8x40xf32>
    %38 = arith.mulf %36, %6 : vector<8x40xf32>
    %39 = arith.mulf %37, %7 : vector<8x40xf32>
    %40 = arith.subf %38, %39 : vector<8x40xf32>
    %41 = arith.mulf %36, %7 : vector<8x40xf32>
    %42 = arith.mulf %37, %6 : vector<8x40xf32>
    %43 = arith.addf %41, %42 : vector<8x40xf32>
    %cst_36 = arith.constant dense<0.000000e+00> : vector<8x64xf32>
    %44 = tpu.matmul %40, %8, %cst_36 {dimension_numbers = #tpu.dot_dimension_numbers<[1], [0], [0], [1], [0, 0, 1, 1], [], []>} : vector<8x40xf32>, vector<40x64xf32>, vector<8x64xf32> -> vector<8x64xf32>
    %cst_37 = arith.constant dense<0.000000e+00> : vector<8x64xf32>
    %45 = tpu.matmul %43, %9, %cst_37 {dimension_numbers = #tpu.dot_dimension_numbers<[1], [0], [0], [1], [0, 0, 1, 1], [], []>} : vector<8x40xf32>, vector<40x64xf32>, vector<8x64xf32> -> vector<8x64xf32>
    %46 = arith.addf %44, %45 : vector<8x64xf32>
    %cst_38 = arith.constant dense<0.000000e+00> : vector<64xf32>
    %47 = vector.multi_reduction <add>, %46, %cst_38 [0] : vector<8x64xf32> to vector<64xf32>
    %48 = vector.shape_cast %47 : vector<64xf32> to vector<1x64xf32>
    %cst_39 = arith.constant 8.000000e+00 : f32
    %49 = vector.broadcast %cst_39 : f32 to vector<1x64xf32>
    %50 = arith.divf %48, %49 : vector<1x64xf32>
    %51 = vector.broadcast %50 : vector<1x64xf32> to vector<8x64xf32>
    %52 = arith.subf %46, %51 : vector<8x64xf32>
    %53 = arith.mulf %52, %52 : vector<8x64xf32>
    %cst_40 = arith.constant dense<0.000000e+00> : vector<64xf32>
    %54 = vector.multi_reduction <add>, %53, %cst_40 [0] : vector<8x64xf32> to vector<64xf32>
    %55 = vector.shape_cast %54 : vector<64xf32> to vector<1x64xf32>
    %cst_41 = arith.constant 8.000000e+00 : f32
    %56 = vector.broadcast %cst_41 : f32 to vector<1x64xf32>
    %57 = arith.divf %55, %56 : vector<1x64xf32>
    %cst_42 = arith.constant 9.99999974E-6 : f32
    %58 = vector.broadcast %cst_42 : f32 to vector<1x64xf32>
    %59 = arith.addf %57, %58 : vector<1x64xf32>
    %60 = math.rsqrt %59 : vector<1x64xf32>
    %61 = vector.broadcast %60 : vector<1x64xf32> to vector<8x64xf32>
    %62 = arith.mulf %52, %61 : vector<8x64xf32>
    %63 = vector.broadcast %2 : vector<8x1xf32> to vector<8x64xf32>
    %64 = arith.mulf %62, %63 : vector<8x64xf32>
    %65 = vector.broadcast %3 : vector<8x1xf32> to vector<8x64xf32>
    %66 = arith.addf %64, %65 : vector<8x64xf32>
    %67 = arith.truncf %66 : vector<8x64xf32> to vector<8x64xbf16>
    %cst_43 = arith.constant dense<0.000000e+00> : vector<32x64xf32>
    %68 = tpu.matmul %10, %67, %cst_43 {dimension_numbers = #tpu.dot_dimension_numbers<[1], [0], [0], [1], [0, 0, 1, 1], [], []>} : vector<32x8xbf16>, vector<8x64xbf16>, vector<32x64xf32> -> vector<32x64xf32>
    %69 = vector.broadcast %11 : vector<32x1xf32> to vector<32x64xf32>
    %70 = arith.addf %68, %69 : vector<32x64xf32>
    %cst_44 = arith.constant 5.000000e-01 : f32
    %71 = vector.broadcast %cst_44 : f32 to vector<32x64xf32>
    %72 = arith.mulf %71, %70 : vector<32x64xf32>
    %cst_45 = arith.constant 0.707106769 : f32
    %73 = vector.broadcast %cst_45 : f32 to vector<32x64xf32>
    %74 = arith.mulf %70, %73 : vector<32x64xf32>
    %75 = math.absf %74 : vector<32x64xf32>
    %cst_46 = arith.constant 0.327591091 : f32
    %76 = vector.broadcast %cst_46 : f32 to vector<32x64xf32>
    %77 = arith.mulf %76, %75 : vector<32x64xf32>
    %cst_47 = arith.constant 1.000000e+00 : f32
    %78 = vector.broadcast %cst_47 : f32 to vector<32x64xf32>
    %79 = arith.addf %78, %77 : vector<32x64xf32>
    %cst_48 = arith.constant 1.000000e+00 : f32
    %80 = vector.broadcast %cst_48 : f32 to vector<32x64xf32>
    %81 = arith.divf %80, %79 : vector<32x64xf32>
    %cst_49 = arith.constant 1.06140542 : f32
    %82 = vector.broadcast %cst_49 : f32 to vector<32x64xf32>
    %83 = arith.mulf %81, %82 : vector<32x64xf32>
    %cst_50 = arith.constant -1.45315206 : f32
    %84 = vector.broadcast %cst_50 : f32 to vector<32x64xf32>
    %85 = arith.addf %84, %83 : vector<32x64xf32>
    %86 = arith.mulf %81, %85 : vector<32x64xf32>
    %cst_51 = arith.constant 1.42141378 : f32
    %87 = vector.broadcast %cst_51 : f32 to vector<32x64xf32>
    %88 = arith.addf %87, %86 : vector<32x64xf32>
    %89 = arith.mulf %81, %88 : vector<32x64xf32>
    %cst_52 = arith.constant -0.284496725 : f32
    %90 = vector.broadcast %cst_52 : f32 to vector<32x64xf32>
    %91 = arith.addf %90, %89 : vector<32x64xf32>
    %92 = arith.mulf %81, %91 : vector<32x64xf32>
    %cst_53 = arith.constant 0.254829586 : f32
    %93 = vector.broadcast %cst_53 : f32 to vector<32x64xf32>
    %94 = arith.addf %93, %92 : vector<32x64xf32>
    %95 = arith.mulf %81, %94 : vector<32x64xf32>
    %cst_54 = arith.constant 0.000000e+00 : f32
    %96 = vector.broadcast %cst_54 : f32 to vector<32x64xf32>
    %97 = arith.subf %96, %75 : vector<32x64xf32>
    %98 = arith.mulf %97, %75 : vector<32x64xf32>
    %99 = math.exp %98 : vector<32x64xf32>
    %100 = arith.mulf %95, %99 : vector<32x64xf32>
    %cst_55 = arith.constant 1.000000e+00 : f32
    %101 = vector.broadcast %cst_55 : f32 to vector<32x64xf32>
    %102 = arith.subf %101, %100 : vector<32x64xf32>
    %cst_56 = arith.constant 0.000000e+00 : f32
    %103 = vector.broadcast %cst_56 : f32 to vector<32x64xf32>
    %104 = arith.cmpf olt, %74, %103 : vector<32x64xf32>
    %cst_57 = arith.constant 0.000000e+00 : f32
    %105 = vector.broadcast %cst_57 : f32 to vector<32x64xf32>
    %106 = arith.subf %105, %102 : vector<32x64xf32>
    %107 = arith.select %104, %106, %102 : vector<32x64xi1>, vector<32x64xf32>
    %cst_58 = arith.constant 1.000000e+00 : f32
    %108 = vector.broadcast %cst_58 : f32 to vector<32x64xf32>
    %109 = arith.addf %108, %107 : vector<32x64xf32>
    %110 = arith.mulf %72, %109 : vector<32x64xf32>
    %111 = arith.truncf %110 : vector<32x64xf32> to vector<32x64xbf16>
    %cst_59 = arith.constant dense<0.000000e+00> : vector<8x64xf32>
    %112 = tpu.matmul %12, %111, %cst_59 {dimension_numbers = #tpu.dot_dimension_numbers<[1], [0], [0], [1], [0, 0, 1, 1], [], []>} : vector<8x32xbf16>, vector<32x64xbf16>, vector<8x64xf32> -> vector<8x64xf32>
    %113 = vector.broadcast %13 : vector<8x1xf32> to vector<8x64xf32>
    %114 = arith.addf %112, %113 : vector<8x64xf32>
    %115 = arith.addf %15, %114 : vector<8x64xf32>
    %c0_60 = arith.constant 0 : index
    %c0_61 = arith.constant 0 : index
    %c0_62 = arith.constant 0 : index
    %116 = vector.load %arg16[%c0_60, %c0_61, %c0_62] : memref<2x8x64xf32, #tpu.memory_space<vmem>>, vector<1x8x64xf32>
    %117 = vector.shape_cast %116 : vector<1x8x64xf32> to vector<8x64xf32>
    %118 = vector.shape_cast %115 : vector<8x64xf32> to vector<1x8x64xf32>
    tpu.vector_store %arg16[%c0_60, %c0_61, %c0_62], %118 {strides = array<i32>} : memref<2x8x64xf32, #tpu.memory_space<vmem>>, vector<1x8x64xf32>,
    %c1 = arith.constant 1 : index
    %c0_63 = arith.constant 0 : index
    %c0_64 = arith.constant 0 : index
    %119 = vector.load %arg1[%c1, %c0_63, %c0_64] : memref<2x8x64xf32, #tpu.memory_space<vmem>>, vector<1x8x64xf32>
    %120 = vector.shape_cast %119 : vector<1x8x64xf32> to vector<8x64xf32>
    %cst_65 = arith.constant dense<0.000000e+00> : vector<64xf32>
    %121 = vector.multi_reduction <add>, %120, %cst_65 [0] : vector<8x64xf32> to vector<64xf32>
    %122 = vector.shape_cast %121 : vector<64xf32> to vector<1x64xf32>
    %cst_66 = arith.constant 8.000000e+00 : f32
    %123 = vector.broadcast %cst_66 : f32 to vector<1x64xf32>
    %124 = arith.divf %122, %123 : vector<1x64xf32>
    %125 = vector.broadcast %124 : vector<1x64xf32> to vector<8x64xf32>
    %126 = arith.subf %120, %125 : vector<8x64xf32>
    %127 = arith.mulf %126, %126 : vector<8x64xf32>
    %cst_67 = arith.constant dense<0.000000e+00> : vector<64xf32>
    %128 = vector.multi_reduction <add>, %127, %cst_67 [0] : vector<8x64xf32> to vector<64xf32>
    %129 = vector.shape_cast %128 : vector<64xf32> to vector<1x64xf32>
    %cst_68 = arith.constant 8.000000e+00 : f32
    %130 = vector.broadcast %cst_68 : f32 to vector<1x64xf32>
    %131 = arith.divf %129, %130 : vector<1x64xf32>
    %cst_69 = arith.constant 9.99999974E-6 : f32
    %132 = vector.broadcast %cst_69 : f32 to vector<1x64xf32>
    %133 = arith.addf %131, %132 : vector<1x64xf32>
    %134 = math.rsqrt %133 : vector<1x64xf32>
    %135 = vector.broadcast %134 : vector<1x64xf32> to vector<8x64xf32>
    %136 = arith.mulf %126, %135 : vector<8x64xf32>
    %137 = vector.broadcast %0 : vector<8x1xf32> to vector<8x64xf32>
    %138 = arith.mulf %136, %137 : vector<8x64xf32>
    %139 = vector.broadcast %1 : vector<8x1xf32> to vector<8x64xf32>
    %140 = arith.addf %138, %139 : vector<8x64xf32>
    %cst_70 = arith.constant dense<0.000000e+00> : vector<8x40xf32>
    %141 = tpu.matmul %140, %4, %cst_70 {dimension_numbers = #tpu.dot_dimension_numbers<[1], [0], [0], [1], [0, 0, 1, 1], [], []>} : vector<8x64xf32>, vector<64x40xf32>, vector<8x40xf32> -> vector<8x40xf32>
    %cst_71 = arith.constant dense<0.000000e+00> : vector<8x40xf32>
    %142 = tpu.matmul %140, %5, %cst_71 {dimension_numbers = #tpu.dot_dimension_numbers<[1], [0], [0], [1], [0, 0, 1, 1], [], []>} : vector<8x64xf32>, vector<64x40xf32>, vector<8x40xf32> -> vector<8x40xf32>
    %143 = arith.mulf %141, %6 : vector<8x40xf32>
    %144 = arith.mulf %142, %7 : vector<8x40xf32>
    %145 = arith.subf %143, %144 : vector<8x40xf32>
    %146 = arith.mulf %141, %7 : vector<8x40xf32>
    %147 = arith.mulf %142, %6 : vector<8x40xf32>
    %148 = arith.addf %146, %147 : vector<8x40xf32>
    %cst_72 = arith.constant dense<0.000000e+00> : vector<8x64xf32>
    %149 = tpu.matmul %145, %8, %cst_72 {dimension_numbers = #tpu.dot_dimension_numbers<[1], [0], [0], [1], [0, 0, 1, 1], [], []>} : vector<8x40xf32>, vector<40x64xf32>, vector<8x64xf32> -> vector<8x64xf32>
    %cst_73 = arith.constant dense<0.000000e+00> : vector<8x64xf32>
    %150 = tpu.matmul %148, %9, %cst_73 {dimension_numbers = #tpu.dot_dimension_numbers<[1], [0], [0], [1], [0, 0, 1, 1], [], []>} : vector<8x40xf32>, vector<40x64xf32>, vector<8x64xf32> -> vector<8x64xf32>
    %151 = arith.addf %149, %150 : vector<8x64xf32>
    %cst_74 = arith.constant dense<0.000000e+00> : vector<64xf32>
    %152 = vector.multi_reduction <add>, %151, %cst_74 [0] : vector<8x64xf32> to vector<64xf32>
    %153 = vector.shape_cast %152 : vector<64xf32> to vector<1x64xf32>
    %cst_75 = arith.constant 8.000000e+00 : f32
    %154 = vector.broadcast %cst_75 : f32 to vector<1x64xf32>
    %155 = arith.divf %153, %154 : vector<1x64xf32>
    %156 = vector.broadcast %155 : vector<1x64xf32> to vector<8x64xf32>
    %157 = arith.subf %151, %156 : vector<8x64xf32>
    %158 = arith.mulf %157, %157 : vector<8x64xf32>
    %cst_76 = arith.constant dense<0.000000e+00> : vector<64xf32>
    %159 = vector.multi_reduction <add>, %158, %cst_76 [0] : vector<8x64xf32> to vector<64xf32>
    %160 = vector.shape_cast %159 : vector<64xf32> to vector<1x64xf32>
    %cst_77 = arith.constant 8.000000e+00 : f32
    %161 = vector.broadcast %cst_77 : f32 to vector<1x64xf32>
    %162 = arith.divf %160, %161 : vector<1x64xf32>
    %cst_78 = arith.constant 9.99999974E-6 : f32
    %163 = vector.broadcast %cst_78 : f32 to vector<1x64xf32>
    %164 = arith.addf %162, %163 : vector<1x64xf32>
    %165 = math.rsqrt %164 : vector<1x64xf32>
    %166 = vector.broadcast %165 : vector<1x64xf32> to vector<8x64xf32>
    %167 = arith.mulf %157, %166 : vector<8x64xf32>
    %168 = vector.broadcast %2 : vector<8x1xf32> to vector<8x64xf32>
    %169 = arith.mulf %167, %168 : vector<8x64xf32>
    %170 = vector.broadcast %3 : vector<8x1xf32> to vector<8x64xf32>
    %171 = arith.addf %169, %170 : vector<8x64xf32>
    %172 = arith.truncf %171 : vector<8x64xf32> to vector<8x64xbf16>
    %cst_79 = arith.constant dense<0.000000e+00> : vector<32x64xf32>
    %173 = tpu.matmul %10, %172, %cst_79 {dimension_numbers = #tpu.dot_dimension_numbers<[1], [0], [0], [1], [0, 0, 1, 1], [], []>} : vector<32x8xbf16>, vector<8x64xbf16>, vector<32x64xf32> -> vector<32x64xf32>
    %174 = vector.broadcast %11 : vector<32x1xf32> to vector<32x64xf32>
    %175 = arith.addf %173, %174 : vector<32x64xf32>
    %cst_80 = arith.constant 5.000000e-01 : f32
    %176 = vector.broadcast %cst_80 : f32 to vector<32x64xf32>
    %177 = arith.mulf %176, %175 : vector<32x64xf32>
    %cst_81 = arith.constant 0.707106769 : f32
    %178 = vector.broadcast %cst_81 : f32 to vector<32x64xf32>
    %179 = arith.mulf %175, %178 : vector<32x64xf32>
    %180 = math.absf %179 : vector<32x64xf32>
    %cst_82 = arith.constant 0.327591091 : f32
    %181 = vector.broadcast %cst_82 : f32 to vector<32x64xf32>
    %182 = arith.mulf %181, %180 : vector<32x64xf32>
    %cst_83 = arith.constant 1.000000e+00 : f32
    %183 = vector.broadcast %cst_83 : f32 to vector<32x64xf32>
    %184 = arith.addf %183, %182 : vector<32x64xf32>
    %cst_84 = arith.constant 1.000000e+00 : f32
    %185 = vector.broadcast %cst_84 : f32 to vector<32x64xf32>
    %186 = arith.divf %185, %184 : vector<32x64xf32>
    %cst_85 = arith.constant 1.06140542 : f32
    %187 = vector.broadcast %cst_85 : f32 to vector<32x64xf32>
    %188 = arith.mulf %186, %187 : vector<32x64xf32>
    %cst_86 = arith.constant -1.45315206 : f32
    %189 = vector.broadcast %cst_86 : f32 to vector<32x64xf32>
    %190 = arith.addf %189, %188 : vector<32x64xf32>
    %191 = arith.mulf %186, %190 : vector<32x64xf32>
    %cst_87 = arith.constant 1.42141378 : f32
    %192 = vector.broadcast %cst_87 : f32 to vector<32x64xf32>
    %193 = arith.addf %192, %191 : vector<32x64xf32>
    %194 = arith.mulf %186, %193 : vector<32x64xf32>
    %cst_88 = arith.constant -0.284496725 : f32
    %195 = vector.broadcast %cst_88 : f32 to vector<32x64xf32>
    %196 = arith.addf %195, %194 : vector<32x64xf32>
    %197 = arith.mulf %186, %196 : vector<32x64xf32>
    %cst_89 = arith.constant 0.254829586 : f32
    %198 = vector.broadcast %cst_89 : f32 to vector<32x64xf32>
    %199 = arith.addf %198, %197 : vector<32x64xf32>
    %200 = arith.mulf %186, %199 : vector<32x64xf32>
    %cst_90 = arith.constant 0.000000e+00 : f32
    %201 = vector.broadcast %cst_90 : f32 to vector<32x64xf32>
    %202 = arith.subf %201, %180 : vector<32x64xf32>
    %203 = arith.mulf %202, %180 : vector<32x64xf32>
    %204 = math.exp %203 : vector<32x64xf32>
    %205 = arith.mulf %200, %204 : vector<32x64xf32>
    %cst_91 = arith.constant 1.000000e+00 : f32
    %206 = vector.broadcast %cst_91 : f32 to vector<32x64xf32>
    %207 = arith.subf %206, %205 : vector<32x64xf32>
    %cst_92 = arith.constant 0.000000e+00 : f32
    %208 = vector.broadcast %cst_92 : f32 to vector<32x64xf32>
    %209 = arith.cmpf olt, %179, %208 : vector<32x64xf32>
    %cst_93 = arith.constant 0.000000e+00 : f32
    %210 = vector.broadcast %cst_93 : f32 to vector<32x64xf32>
    %211 = arith.subf %210, %207 : vector<32x64xf32>
    %212 = arith.select %209, %211, %207 : vector<32x64xi1>, vector<32x64xf32>
    %cst_94 = arith.constant 1.000000e+00 : f32
    %213 = vector.broadcast %cst_94 : f32 to vector<32x64xf32>
    %214 = arith.addf %213, %212 : vector<32x64xf32>
    %215 = arith.mulf %177, %214 : vector<32x64xf32>
    %216 = arith.truncf %215 : vector<32x64xf32> to vector<32x64xbf16>
    %cst_95 = arith.constant dense<0.000000e+00> : vector<8x64xf32>
    %217 = tpu.matmul %12, %216, %cst_95 {dimension_numbers = #tpu.dot_dimension_numbers<[1], [0], [0], [1], [0, 0, 1, 1], [], []>} : vector<8x32xbf16>, vector<32x64xbf16>, vector<8x64xf32> -> vector<8x64xf32>
    %218 = vector.broadcast %13 : vector<8x1xf32> to vector<8x64xf32>
    %219 = arith.addf %217, %218 : vector<8x64xf32>
    %220 = arith.addf %120, %219 : vector<8x64xf32>
    %c1_96 = arith.constant 1 : index
    %c0_97 = arith.constant 0 : index
    %c0_98 = arith.constant 0 : index
    %221 = vector.load %arg16[%c1_96, %c0_97, %c0_98] : memref<2x8x64xf32, #tpu.memory_space<vmem>>, vector<1x8x64xf32>
    %222 = vector.shape_cast %221 : vector<1x8x64xf32> to vector<8x64xf32>
    %223 = vector.shape_cast %220 : vector<8x64xf32> to vector<1x8x64xf32>
    tpu.vector_store %arg16[%c1_96, %c0_97, %c0_98], %223 {strides = array<i32>} : memref<2x8x64xf32, #tpu.memory_space<vmem>>, vector<1x8x64xf32>,
    return
  }
  func.func @transform_0(%arg0: i32) -> (i32, i32, i32) {
    %c0_i32 = arith.constant 0 : i32
    %c0_i32_0 = arith.constant 0 : i32
    %c0_i32_1 = arith.constant 0 : i32
    return %arg0, %c0_i32, %c0_i32_0 : i32, i32, i32
  }
  func.func @transform_1(%arg0: i32) -> (i32, i32) {
    %c0_i32 = arith.constant 0 : i32
    %c0_i32_0 = arith.constant 0 : i32
    %c0_i32_1 = arith.constant 0 : i32
    return %c0_i32, %c0_i32_0 : i32, i32
  }
  func.func @transform_2(%arg0: i32) -> (i32, i32) {
    %c0_i32 = arith.constant 0 : i32
    %c0_i32_0 = arith.constant 0 : i32
    %c0_i32_1 = arith.constant 0 : i32
    return %c0_i32, %c0_i32_0 : i32, i32
  }
  func.func @transform_3(%arg0: i32) -> (i32, i32) {
    %c0_i32 = arith.constant 0 : i32
    %c0_i32_0 = arith.constant 0 : i32
    %c0_i32_1 = arith.constant 0 : i32
    return %c0_i32, %c0_i32_0 : i32, i32
  }
  func.func @transform_4(%arg0: i32) -> (i32, i32) {
    %c0_i32 = arith.constant 0 : i32
    %c0_i32_0 = arith.constant 0 : i32
    %c0_i32_1 = arith.constant 0 : i32
    return %c0_i32, %c0_i32_0 : i32, i32
  }
  func.func @transform_5(%arg0: i32) -> (i32, i32) {
    %c0_i32 = arith.constant 0 : i32
    %c0_i32_0 = arith.constant 0 : i32
    %c0_i32_1 = arith.constant 0 : i32
    return %c0_i32, %c0_i32_0 : i32, i32
  }
  func.func @transform_6(%arg0: i32) -> (i32, i32) {
    %c0_i32 = arith.constant 0 : i32
    %c0_i32_0 = arith.constant 0 : i32
    %c0_i32_1 = arith.constant 0 : i32
    return %c0_i32, %c0_i32_0 : i32, i32
  }
  func.func @transform_7(%arg0: i32) -> (i32, i32) {
    %c0_i32 = arith.constant 0 : i32
    %c0_i32_0 = arith.constant 0 : i32
    %c0_i32_1 = arith.constant 0 : i32
    return %c0_i32, %c0_i32_0 : i32, i32
  }
  func.func @transform_8(%arg0: i32) -> (i32, i32) {
    %c0_i32 = arith.constant 0 : i32
    %c0_i32_0 = arith.constant 0 : i32
    %c0_i32_1 = arith.constant 0 : i32
    return %c0_i32, %c0_i32_0 : i32, i32
  }
  func.func @transform_9(%arg0: i32) -> (i32, i32) {
    %c0_i32 = arith.constant 0 : i32
    %c0_i32_0 = arith.constant 0 : i32
    %c0_i32_1 = arith.constant 0 : i32
    return %c0_i32, %c0_i32_0 : i32, i32
  }
  func.func @transform_10(%arg0: i32) -> (i32, i32) {
    %c0_i32 = arith.constant 0 : i32
    %c0_i32_0 = arith.constant 0 : i32
    %c0_i32_1 = arith.constant 0 : i32
    return %c0_i32, %c0_i32_0 : i32, i32
  }
  func.func @transform_11(%arg0: i32) -> (i32, i32) {
    %c0_i32 = arith.constant 0 : i32
    %c0_i32_0 = arith.constant 0 : i32
    %c0_i32_1 = arith.constant 0 : i32
    return %c0_i32, %c0_i32_0 : i32, i32
  }
  func.func @transform_12(%arg0: i32) -> (i32, i32) {
    %c0_i32 = arith.constant 0 : i32
    %c0_i32_0 = arith.constant 0 : i32
    %c0_i32_1 = arith.constant 0 : i32
    return %c0_i32, %c0_i32_0 : i32, i32
  }
  func.func @transform_13(%arg0: i32) -> (i32, i32) {
    %c0_i32 = arith.constant 0 : i32
    %c0_i32_0 = arith.constant 0 : i32
    %c0_i32_1 = arith.constant 0 : i32
    return %c0_i32, %c0_i32_0 : i32, i32
  }
  func.func @transform_14(%arg0: i32) -> (i32, i32) {
    %c0_i32 = arith.constant 0 : i32
    %c0_i32_0 = arith.constant 0 : i32
    %c0_i32_1 = arith.constant 0 : i32
    return %c0_i32, %c0_i32_0 : i32, i32
  }
  func.func @transform_15(%arg0: i32) -> (i32, i32, i32) {
    %c0_i32 = arith.constant 0 : i32
    %c0_i32_0 = arith.constant 0 : i32
    %c0_i32_1 = arith.constant 0 : i32
    return %arg0, %c0_i32, %c0_i32_0 : i32, i32, i32
  }
}

</mosaic_0001>

<bundles_post_ra>
// kernel: block_spect_forward.1
= control target key start
LH: loop header
LB: loop body
LE: loop exit
PB: predicated region body
PF: predicated region fallthrough
CT: control target
= control target key end

     0   :  { %v1559_v0 = vmov 0   ;;  %v1560_v2 = vmov 0.0   ;;  %vm1561_vm0 = vmmov 0   ;;  %vm94_vm1 = vcmask 523264   ;;  %s2112_s1 = inlined_call_operand.vmem [shape: f32[8,1], index: 1, kind: input, shape index: {}]   ;;  %s2113_s2 = inlined_call_operand.vmem [shape: f32[8,1], index: 2, kind: input, shape index: {}]   ;;  %s2114_s3 = inlined_call_operand.vmem [shape: f32[64,40], index: 3, kind: input, shape index: {}]   ;;  %s2115_s4 = inlined_call_operand.vmem [shape: f32[64,40], index: 4, kind: input, shape index: {}]   ;;  %s2116_s12 = inlined_call_operand.vmem [shape: f32[32,1], index: 12, kind: input, shape index: {}]   ;;  %s2117_s14 = inlined_call_operand.vmem [shape: f32[8,1], index: 14, kind: input, shape index: {}]   ;;  %s2118_s0 = inlined_call_operand.vmem [shape: f32[2,8,64], index: 0, kind: input, shape index: {}]   ;;  %s2119_s8 = inlined_call_operand.vmem [shape: f32[40,64], index: 8, kind: input, shape index: {}]   ;;  %s2120_s7 = inlined_call_operand.vmem [shape: f32[40,64], index: 7, kind: input, shape index: {}]   ;;  %s2121_s9 = inlined_call_operand.vmem [shape: f32[8,1], index: 9, kind: input, shape index: {}]   ;;  %s2122_s10 = inlined_call_operand.vmem [shape: f32[8,1], index: 10, kind: input, shape index: {}]   ;;  %s2123_s5 = inlined_call_operand.vmem [shape: f32[8,40], index: 5, kind: input, shape index: {}]   ;;  %s2124_s6 = inlined_call_operand.vmem [shape: f32[8,40], index: 6, kind: input, shape index: {}]   ;;  %s2125_s11 = inlined_call_operand.vmem [shape: bf16[32,8], index: 11, kind: input, shape index: {}]   ;;  %s2126_s13 = inlined_call_operand.vmem [shape: bf16[8,32], index: 13, kind: input, shape index: {}]   ;;  %s2127_s15 = inlined_call_operand.vmem [shape: f32[2,8,64], index: 15, kind: output, shape index: {}]  }
   0x1   :  { %1514 = vset.pattern.permute.xlu0 %v1559_v0  ;;  %v51_v1 = vld [vmem:[%s2112_s1] sm:$0xff]  ;;  %1353 = vmatprep.subr.mxu0 %v1560_v2  ;;  %v1654_v4 = vld [vmem:[%s2114_s3 + $0x38] sm:$0xff]  ;;  %v1665_v6 = vld [vmem:[%s2114_s3 + $0x30] sm:$0xff]  ;;  %vm278_vm2 = vcmask 326656   ;;  %vm489_vm3 = vcmask 64512   ;;  %vm496_vm4 = vcmask 1043456  }
   0x2   :  { %119 = vperm.xlu0 %1514, %v51_v1   ;;  %v52_v3 = vld [vmem:[%s2113_s2] sm:$0xff]  ;;  %1372 = vmatprep.subr.mxu1 %v1560_v2  ;;  %v1660_v5 = vld [vmem:[%s2115_s4 + $0x38] sm:$0xff]  ;;  %v1670_v7 = vld [vmem:[%s2115_s4 + $0x30] sm:$0xff]  ;;  %vm664_vm9 = vcmask 261120  }
   0x3   :  { %1354 = vmatpush3.msra.mxu0 %v1654_v4  ;;  %1369 = vmatprep.mubr.msk.f32.mxu0 %vm1561_vm0, %v1560_v2  ;;  %v1681_v8 = vld [vmem:[%s2114_s3 + $0x28] sm:$0xff]  ;;  %v89_v10 = vld [vmem:[%s2116_s12 + $0x10] sm:$0xff]  ;;  %v1697_v11 = vld [vmem:[%s2114_s3 + $0x20] sm:$0xff] }
   0x4   :  { %1373 = vmatpush3.msra.mxu1 %v1660_v5  ;;  %1355 = vmatprep.subr.mxu0 %v1560_v2  ;;  %v1686_v9 = vld [vmem:[%s2115_s4 + $0x28] sm:$0xff]  ;;  %v1704_v12 = vld [vmem:[%s2115_s4 + $0x20] sm:$0xff]  ;;  %v1711_v13 = vld [vmem:[%s2114_s3 + $0x18] sm:$0xff] }
   0x5   :  { %1374 = vmatprep.subr.mxu1 %v1560_v2  ;;  %1356 = vmatpush3.msra.mxu0 %v1665_v6  ;;  %v1717_v14 = vld [vmem:[%s2115_s4 + $0x18] sm:$0xff]  ;;  %v87_v15 = vld [vmem:[%s2116_s12] sm:$0xff]  ;;  %v1729_v16 = vld [vmem:[%s2114_s3 + $0x10] sm:$0xff] }
   0x6   :  { %125 = vperm.xlu0 %1514, %v52_v3   ;;  %1375 = vmatpush3.msra.mxu1 %v1670_v7  ;;  %v1734_v17 = vld [vmem:[%s2115_s4 + $0x10] sm:$0xff]  ;;  %v1742_v18 = vld [vmem:[%s2114_s3 + $0x8] sm:$0xff]  ;;  %v92_v20 = vld [vmem:[%s2117_s14] sm:$0xff] }
   0x7   :  { %1357 = vmatprep.subr.mxu0 %v1560_v2  ;;  %1376 = vmatprep.subr.mxu1 %v1560_v2  ;;  %v1747_v19 = vld [vmem:[%s2115_s4 + $0x8] sm:$0xff]  ;;  %v1759_v21 = vld [vmem:[%s2114_s3] sm:$0xff] }
   0x8   :  { %1358 = vmatpush3.msra.mxu0 %v1681_v8  ;;  %1377 = vmatpush3.msra.mxu1 %v1686_v9  ;;  %v1766_v22 = vld [vmem:[%s2115_s4] sm:$0xff]  ;;  %v1272_v24 = vld [vmem:[%s2118_s0 + $0x8] sm:$0xff] }
   0x9   :  { %1359 = vmatprep.subr.mxu0 %v1560_v2  ;;  %1378 = vmatprep.subr.mxu1 %v1560_v2  ;;  %v1780_v23 = vld [vmem:[%s2118_s0] sm:$0xff]  ;;  %v712_v26 = vsel %vm94_vm1, %v1272_v24, 0.0 }
   0xa   :  { %471 = vperm.xlu0 %1514, %v89_v10   ;;  %1360 = vmatpush3.msra.mxu0 %v1697_v11  ;;  %v95_v25 = vsel %vm94_vm1, %v1780_v23, 0.0  ;;  %v713_v28 = vrot.slane %v712_v26, 4 }
   0xb   :  { %1379 = vmatpush3.msra.mxu1 %v1704_v12  ;;  %1361 = vmatprep.subr.mxu0 %v1560_v2  ;;  %v96_v27 = vrot.slane %v95_v25, 4 }
   0xc   :  { %1380 = vmatprep.subr.mxu1 %v1560_v2  ;;  %1362 = vmatpush3.msra.mxu0 %v1711_v13  ;;  %v714_v30 = vadd.f32 %v713_v28, %v712_v26  ;;  %v1801_v28 = vld [vmem:[%s2120_s7 + $0x20] sm:$0xff] }
   0xd   :  { %1381 = vmatpush3.msra.mxu1 %v1717_v14  ;;  %1363 = vmatprep.subr.mxu0 %v1560_v2  ;;  %v97_v29 = vadd.f32 %v96_v27, %v95_v25  ;;  %v1796_v27 = vld [vmem:[%s2119_s8 + $0x20] sm:$0xff] }
   0xe   :  { %461 = vperm.xlu0 %1514, %v87_v15   ;;  %1382 = vmatprep.subr.mxu1 %v1560_v2  ;;  %v715_v32 = vrot.slane %v714_v30, 2 }
   0xf   :  { %1364 = vmatpush3.msra.mxu0 %v1729_v16  ;;  %1383 = vmatpush3.msra.mxu1 %v1734_v17  ;;  %v98_v31 = vrot.slane %v97_v29, 2 }
  0x10   :  { %1365 = vmatprep.subr.mxu0 %v1560_v2  ;;  %1384 = vmatprep.subr.mxu1 %v1560_v2  ;;  %v716_v34 = vadd.f32 %v715_v32, %v714_v30  ;;  %v1813_v30 = vld [vmem:[%s2120_s7 + $0x18] sm:$0xff]  ;;  %v1837_v32 = vld [vmem:[%s2120_s7 + $0x10] sm:$0xff] }
  0x11   :  { %1366 = vmatpush3.msra.mxu0 %v1742_v18  ;;  %1385 = vmatpush3.msra.mxu1 %v1747_v19  ;;  %v99_v33 = vadd.f32 %v98_v31, %v97_v29  ;;  %v1808_v29 = vld [vmem:[%s2119_s8 + $0x18] sm:$0xff]  ;;  %v1822_v31 = vld [vmem:[%s2119_s8 + $0x10] sm:$0xff] }
  0x12   :  { %661 = vperm.xlu0 %1514, %v92_v20   ;;  %1367 = vmatprep.subr.mxu0 %v1560_v2  ;;  %v717_v36 = vrot.slane %v716_v34, 1 }
  0x13   :  { %1386 = vmatprep.subr.mxu1 %v1560_v2  ;;  %1368 = vmatpush3.msra.mxu0 %v1759_v21  ;;  %v100_v35 = vrot.slane %v99_v33, 1 }
  0x14   :  { %1387 = vmatpush3.msra.mxu1 %v1766_v22  ;;  %1388 = vmatprep.mubr.msk.f32.mxu1 %vm1561_vm0, %v1560_v2  ;;  %v718_v38 = vadd.f32 %v717_v36, %v716_v34  ;;  %v1850_v34 = vld [vmem:[%s2120_s7 + $0x8] sm:$0xff]  ;;  %v1861_v36 = vld [vmem:[%s2120_s7] sm:$0xff] }
  0x15   :  { %1391 = vmatprep.subr.mxu0 %v1560_v2  ;;  %1404 = vmatprep.subr.mxu1 %v1560_v2  ;;  %v101_v37 = vadd.f32 %v100_v35, %v99_v33  ;;  %v1843_v33 = vld [vmem:[%s2119_s8 + $0x8] sm:$0xff]  ;;  %v78_v35 = vld [vmem:[%s2119_s8] sm:$0xff] }
  0x16   :  { %1515 = vset.pattern.permute.xlu1 %v1559_v0  ;;  %v719_v40 = vmul.f32 0.125, %v718_v38  ;;  %v54_v38 = vld [vmem:[%s2122_s10] sm:$0xff] }
  0x17   :  { %v103_v39 = vmul.f32 0.125, %v101_v37  ;;  %v53_v37 = vld [vmem:[%s2121_s9] sm:$0xff] }
  0x18   :  { %v720_v42 = vsub.f32 %v1272_v24, %v719_v40  ;;  %448 = vperm.xlu1 %1515, %v53_v37   ;;  %v88_v40 = vld [vmem:[%s2116_s12 + $0x8] sm:$0xff] }
  0x19   :  { %v104_v41 = vsub.f32 %v1780_v23, %v103_v39  ;;  %v90_v39 = vld [vmem:[%s2116_s12 + $0x18] sm:$0xff] }
  0x1a   :  { %v721_v44 = vmul.f32 %v720_v42, %v720_v42 }
  0x1b   :  { %v105_v43 = vmul.f32 %v104_v41, %v104_v41 }
  0x1c   :  { %v722_v46 = vsel %vm94_vm1, %v721_v44, 0.0  ;;  %454 = vperm.xlu1 %1515, %v54_v38  }
  0x1d   :  { %v106_v45 = vsel %vm94_vm1, %v105_v43, 0.0  ;;  %v723_v48 = vrot.slane %v722_v46, 4 }
  0x1e   :  { %v107_v47 = vrot.slane %v106_v45, 4 }
  0x1f   :  { %v724_v50 = vadd.f32 %v723_v48, %v722_v46 }
  0x20   :  { %v108_v49 = vadd.f32 %v107_v47, %v106_v45  ;;  %476 = vperm.xlu1 %1515, %v90_v39  }
  0x21   :  { %v725_v52 = vrot.slane %v724_v50, 2 }
  0x22   :  { %v109_v51 = vrot.slane %v108_v49, 2 }
  0x23   :  { %v726_v54 = vadd.f32 %v725_v52, %v724_v50 }
  0x24   :  { %v110_v53 = vadd.f32 %v109_v51, %v108_v49  ;;  %466 = vperm.xlu1 %1515, %v88_v40   ;;  %v1945_v40 = vld [vmem:[%s2125_s11 + $0x8] sm:$0xff]  }
  0x25   :  { %v727_v56 = vrot.slane %v726_v54, 1 }
  0x26   :  { %v111_v55 = vrot.slane %v110_v53, 1 }
  0x27   :  { %v728_v58 = vadd.f32 %v727_v56, %v726_v54 }
  0x28   :  { %v112_v57 = vadd.f32 %v111_v55, %v110_v53 }
  0x29   :  { %v729_v60 = vmul.f32 0.125, %v728_v58 }
  0x2a   :  { %v113_v59 = vmul.f32 0.125, %v112_v57 }
  0x2b   :  { %v730_v62 = vadd.f32 1e-05, %v729_v60 }
  0x2c   :  { %v114_v61 = vadd.f32 1e-05, %v113_v59 }
  0x2e   :  { %1518 = vrsqrt.f32 %v114_v61 }
  0x2f   :  { %1520 = vrsqrt.f32 %v730_v62 }
  0x3b   :  { %v1519_v63 = vpop.eup %1518 }
  0x3c   :  { %v1521_v0 = vpop.eup %1520  ;;  %v116_v1 = vmul.f32 %v1519_v63, %v104_v41  ;;  %v1880_v41 = vld [vmem:[%s2123_s5] sm:$0xff] }
  0x3d   :  { %v732_v3 = vmul.f32 %v1521_v0, %v720_v42  ;;  %v1885_v42 = vld [vmem:[%s2124_s6] sm:$0xff] }
  0x7d   :  { %v120_v10 = vpop.permute.xlu0 %119 }
  0x7e   :  { %v122_v15 = vmul.f32 %v120_v10, %v116_v1  ;;  %v733_v20 = vmul.f32 %v732_v3, %v120_v10 }
  0x81   :  { %v126_v24 = vpop.permute.xlu0 %125 }
  0x82   :  { %v128_v25 = vadd.f32 %v126_v24, %v122_v15  ;;  %v1791_v26 = vadd.f32 %v733_v20, %v126_v24 }
  0x84   :  { %1370 = vmatmul.mubr.msk.f32.vlgmr.msra.gmra.mxu0 %vm94_vm1, %v128_v25  ;;  %1389 = vmatmul.mubr.msk.f32.vlgmr.msra.gmra.mxu1 %vm94_vm1, %v128_v25 }
  0x85   :  { %1392 = vmatpush3.msra.mxu0 %v1796_v27  ;;  %1405 = vmatpush3.msra.mxu1 %v1801_v28 }
  0x86   :  { %1393 = vmatprep.subr.mxu0 %v1560_v2  ;;  %1406 = vmatprep.subr.mxu1 %v1560_v2 }
  0x87   :  { %1394 = vmatpush3.msra.mxu0 %v1808_v29  ;;  %1407 = vmatpush3.msra.mxu1 %v1813_v30 }
  0x88   :  { %1395 = vmatprep.subr.mxu0 %v1560_v2  ;;  %1408 = vmatprep.subr.mxu1 %v1560_v2 }
  0x89   :  { %1396 = vmatpush3.msra.mxu0 %v1822_v31  ;;  %1401 = vmatprep.mubr.msk.f32.mxu0 %vm1561_vm0, %v1560_v2 }
  0x8a   :  { %1397 = vmatprep.subr.mxu0 %v1560_v2  ;;  %1414 = vmatprep.mubr.msk.f32.mxu1 %vm1561_vm0, %v1560_v2 }
  0x8b   :  { %1409 = vmatpush3.msra.mxu1 %v1837_v32  ;;  %1398 = vmatpush3.msra.mxu0 %v1843_v33 }
  0x8c   :  { %1410 = vmatprep.subr.mxu1 %v1560_v2  ;;  %1399 = vmatprep.subr.mxu0 %v1560_v2 }
  0x8d   :  { %1411 = vmatpush3.msra.mxu1 %v1850_v34  ;;  %1400 = vmatpush3.msra.mxu0 %v78_v35 }
  0x8e   :  { %1412 = vmatprep.subr.mxu1 %v1560_v2  ;;  %1431 = vmatprep.subr.mxu0 %v1560_v2 }
  0x8f   :  { %1413 = vmatpush3.msra.mxu1 %v1861_v36 }
 0x144   :  { %v198_v43 = vpop.f32.mrf.mxu0  ;;  %v268_v44 = vpop.f32.mrf.mxu1 }
 0x145   :  { %v272_v45 = vmul.f32 %v198_v43, %v1880_v41  ;;  %v275_v46 = vmul.f32 %v198_v43, %v1885_v42  ;;  %v273_v47 = vmul.f32 %v268_v44, %v1885_v42  ;;  %v276_v48 = vmul.f32 %v268_v44, %v1880_v41  ;;  %v1952_v43 = vpop.permute.xlu0 %471 }
 0x146   :  { %v1371_v49 = vpop.f32.mrf.mxu0  ;;  %v1390_v50 = vpop.f32.mrf.mxu1 }
 0x147   :  { %v274_v51 = vsub.f32 %v272_v45, %v273_v47  ;;  %v277_v52 = vadd.f32 %v276_v48, %v275_v46 }
 0x149   :  { %1402 = vmatmul.mubr.msk.f32.vlgmr.msra.gmra.mxu0 %vm278_vm2, %v277_v52  ;;  %1415 = vmatmul.mubr.msk.f32.vlgmr.msra.gmra.mxu1 %vm278_vm2, %v274_v51  ;;  %v1959_v47 = vpop.permute.xlu0 %461 }
 0x14a   :  { %1432 = vmatpush3.msra.mxu0 %v1654_v4  ;;  %1447 = vmatprep.mubr.msk.f32.mxu0 %vm1561_vm0, %v1560_v2  ;;  %v1926_v4 = vld [vmem:[%s2125_s11] sm:$0xff]  }
 0x14b   :  { %1433 = vmatprep.subr.mxu0 %v1560_v2  ;;  %1419 = vmatprep.mubr.msk.bf16.mxu1 %vm489_vm3, %v1926_v4 }
 0x14c   :  { %1434 = vmatpush3.msra.mxu0 %v1665_v6 }
 0x14d   :  { %1435 = vmatprep.subr.mxu0 %v1560_v2 }
 0x14e   :  { %1436 = vmatpush3.msra.mxu0 %v1681_v8 }
 0x14f   :  { %1437 = vmatprep.subr.mxu0 %v1560_v2 }
 0x150   :  { %1438 = vmatpush3.msra.mxu0 %v1697_v11 }
 0x151   :  { %1439 = vmatprep.subr.mxu0 %v1560_v2 }
 0x152   :  { %1440 = vmatpush3.msra.mxu0 %v1711_v13 }
 0x153   :  { %1441 = vmatprep.subr.mxu0 %v1560_v2 }
 0x154   :  { %1442 = vmatpush3.msra.mxu0 %v1729_v16 }
 0x155   :  { %1443 = vmatprep.subr.mxu0 %v1560_v2 }
 0x156   :  { %1444 = vmatpush3.msra.mxu0 %v1742_v18 }
 0x157   :  { %1445 = vmatprep.subr.mxu0 %v1560_v2 }
 0x158   :  { %1446 = vmatpush3.msra.mxu0 %v1759_v21 }
 0x159   :  { %1448 = vmatmul.mubr.msk.f32.vlgmr.msra.gmra.mxu0 %vm94_vm1, %v1791_v26  ;;  %1469 = vmatprep.subr.mxu0 %v1560_v2 }
 0x15a   :  { %1470 = vmatpush3.msra.mxu0 %v1796_v27  ;;  %1479 = vmatprep.mubr.msk.f32.mxu0 %vm1561_vm0, %v1560_v2  ;;  %v1934_v27 = vpop.permute.xlu1 %448 }
 0x15b   :  { %1471 = vmatprep.subr.mxu0 %v1560_v2 }
 0x15c   :  { %1472 = vmatpush3.msra.mxu0 %v1808_v29 }
 0x15d   :  { %1473 = vmatprep.subr.mxu0 %v1560_v2 }
 0x15e   :  { %1474 = vmatpush3.msra.mxu0 %v1822_v31 }
 0x15f   :  { %1475 = vmatprep.subr.mxu0 %v1560_v2 }
 0x160   :  { %1476 = vmatpush3.msra.mxu0 %v1843_v33 }
 0x161   :  { %1477 = vmatprep.subr.mxu0 %v1560_v2 }
 0x162   :  { %1478 = vmatpush3.msra.mxu0 %v78_v35  ;;  %v1937_v35 = vpop.permute.xlu1 %454 }
 0x166   :  { %v1954_v45 = vpop.permute.xlu1 %476 }
 0x209   :  { %v348_v6 = vpop.f32.mrf.mxu0  ;;  %v421_v8 = vpop.f32.mrf.mxu1 }
 0x20a   :  { %v422_v11 = vadd.f32 %v421_v8, %v348_v6 }
 0x20b   :  { %v1403_v13 = vpop.f32.mrf.mxu0  ;;  %v1416_v16 = vpop.f32.mrf.mxu1 }
 0x20c   :  { %v425_v18 = vsel %vm94_vm1, %v422_v11, 0.0  ;;  %v1974_v13 = vpop.permute.xlu1 %466 }
 0x20d   :  { %v426_v21 = vrot.slane %v425_v18, 4 }
 0x20f   :  { %v427_v53 = vadd.f32 %v426_v21, %v425_v18 }
 0x211   :  { %v428_v54 = vrot.slane %v427_v53, 2 }
 0x213   :  { %v429_v55 = vadd.f32 %v428_v54, %v427_v53 }
 0x215   :  { %v430_v56 = vrot.slane %v429_v55, 1 }
 0x217   :  { %v431_v57 = vadd.f32 %v430_v56, %v429_v55 }
 0x219   :  { %v432_v58 = vmul.f32 0.125, %v431_v57  ;;  %v1931_v59 = vpop.f32.mrf.mxu0 }
 0x21b   :  { %v433_v60 = vsub.f32 %v422_v11, %v432_v58  ;;  %v1449_v61 = vpop.f32.mrf.mxu0 }
 0x21d   :  { %v434_v62 = vmul.f32 %v433_v60, %v433_v60 }
 0x21f   :  { %v435_v63 = vsel %vm94_vm1, %v434_v62, 0.0 }
 0x220   :  { %v436_v0 = vrot.slane %v435_v63, 4 }
 0x222   :  { %v437_v1 = vadd.f32 %v436_v0, %v435_v63 }
 0x224   :  { %v438_v3 = vrot.slane %v437_v1, 2 }
 0x226   :  { %v439_v10 = vadd.f32 %v438_v3, %v437_v1 }
 0x228   :  { %v440_v15 = vrot.slane %v439_v10, 1 }
 0x22a   :  { %v441_v20 = vadd.f32 %v440_v15, %v439_v10 }
 0x22c   :  { %v442_v24 = vmul.f32 0.125, %v441_v20 }
 0x22e   :  { %v443_v25 = vadd.f32 1e-05, %v442_v24 }
 0x230   :  { %1522 = vrsqrt.f32 %v443_v25 }
 0x23d   :  { %v1523_v29 = vpop.eup %1522 }
 0x23e   :  { %v445_v31 = vmul.f32 %v1523_v29, %v433_v60 }
 0x240   :  { %v451_v33 = vmul.f32 %v1934_v27, %v445_v31 }
 0x242   :  { %v457_v37 = vadd.f32 %v1937_v35, %v451_v33 }
 0x244   :  { %v458_v38 = vpack.c.bf16 %v457_v37, %v457_v37 }
 0x246   :  { %1509 = vmatprep.subr.msk.bf16.mxu1 %vm496_vm4, %v458_v38  ;;  %v498_v39 = vsel %vm496_vm4, %v458_v38, 0 }
 0x247   :  { %1418 = vmatpush3.bf16.msra.mxu1 %v498_v39 }
 0x248   :  { %1423 = vmatprep.subr.bf16.mxu1 %v1560_v2 }
 0x24a   :  { %1420 = vmatmul.mubr.msk.bf16.vlgmr.msra.gmra.mxu1 %vm489_vm3, %v1945_v40 }
 0x24b   :  { %1427 = vmatprep.mubr.msk.bf16.mxu1 %vm1561_vm0, %v1560_v2 }
 0x30a   :  { %v1421_v44 = vpop.f32.mrf.mxu1 }
 0x30b   :  { %v1957_v46 = vadd.f32 %v1421_v44, %v1952_v43 }
 0x30c   :  { %v534_v48 = vpop.f32.mrf.mxu1 }
 0x30d   :  { %v1962_v49 = vmul.f32 0.70710677, %v1957_v46  ;;  %v1965_v50 = vadd.f32 %v534_v48, %v1959_v47 }
 0x30e   :  { %v1422_v51 = vpop.f32.mrf.mxu1 }
 0x30f   :  { %v559_v52 = vand.u32 2147483647, %v1962_v49  ;;  %v1969_v6 = vmul.f32 0.70710677, %v1965_v50  ;;  %v1972_v8 = vadd.f32 %v1422_v51, %v1954_v45  ;;  %vm639_vm5 = vcmp.lt.f32.partialorder %v1962_v49, 0.0 }
 0x310   :  { %v537_v11 = vpop.f32.mrf.mxu1 }
 0x311   :  { %v563_v16 = vmul.f32 0.3275911, %v559_v52  ;;  %v557_v18 = vand.u32 2147483647, %v1969_v6  ;;  %v1978_v21 = vmul.f32 0.70710677, %v1972_v8  ;;  %v1981_v53 = vadd.f32 %v537_v11, %v1974_v13 }
 0x312   :  { %v615_v1 = vsub.f32 0.0, %v559_v52  ;;  %vm637_vm6 = vcmp.lt.f32.partialorder %v1969_v6, 0.0 }
 0x313   :  { %v567_v54 = vadd.f32 1.0, %v563_v16  ;;  %v561_v55 = vmul.f32 0.3275911, %v557_v18  ;;  %v560_v56 = vand.u32 2147483647, %v1978_v21  ;;  %v613_v3 = vsub.f32 0.0, %v557_v18 }
 0x314   :  { %v1985_v57 = vmul.f32 0.70710677, %v1981_v53  ;;  %v619_v10 = vmul.f32 %v615_v1, %v559_v52  ;;  %vm640_vm7 = vcmp.lt.f32.partialorder %v1978_v21, 0.0  ;;  %v549_v21 = vmul.f32 0.5, %v1965_v50 }
 0x315   :  { %1524 = vrcp.f32 %v567_v54  ;;  %v565_v58 = vadd.f32 1.0, %v561_v55  ;;  %v564_v60 = vmul.f32 0.3275911, %v560_v56  ;;  %v616_v15 = vsub.f32 0.0, %v560_v56 }
 0x316   :  { %v558_v61 = vand.u32 2147483647, %v1985_v57  ;;  %v617_v24 = vmul.f32 %v613_v3, %v557_v18  ;;  %v625_v29 = vmul.f32 1.442695, %v619_v10  ;;  %vm638_vm8 = vcmp.lt.f32.partialorder %v1985_v57, 0.0 }
 0x317   :  { %1526 = vrcp.f32 %v565_v58  ;;  %v568_v62 = vadd.f32 1.0, %v564_v60  ;;  %v620_v33 = vmul.f32 %v616_v15, %v560_v56 }
 0x318   :  { %v562_v63 = vmul.f32 0.3275911, %v558_v61  ;;  %v614_v31 = vsub.f32 0.0, %v558_v61  ;;  %v621_v44 = vmul.f32 1.442695, %v617_v24 }
 0x319   :  { %1528 = vrcp.f32 %v568_v62  ;;  %v627_v55 = vmul.f32 1.442695, %v620_v33 }
 0x31a   :  { %v566_v0 = vadd.f32 1.0, %v562_v63  ;;  %v618_v11 = vmul.f32 %v614_v31, %v558_v61 }
 0x31c   :  { %1530 = vrcp.f32 %v566_v0  ;;  %v623_v0 = vmul.f32 1.442695, %v618_v11 }
 0x31d   :  { %1532 = vpow2.f32 %v625_v29 }
 0x31e   :  { %1534 = vpow2.f32 %v621_v44 }
 0x31f   :  { %1536 = vpow2.f32 %v627_v55 }
 0x320   :  { %1538 = vpow2.f32 %v623_v0 }
 0x322   :  { %v1525_v20 = vpop.eup %1524 }
 0x323   :  { %v579_v25 = vmul.f32 1.0614054, %v1525_v20 }
 0x324   :  { %v1527_v37 = vpop.eup %1526 }
 0x325   :  { %v583_v38 = vadd.f32 -1.4531521, %v579_v25  ;;  %v577_v39 = vmul.f32 1.0614054, %v1527_v37 }
 0x326   :  { %v1529_v48 = vpop.eup %1528 }
 0x327   :  { %v587_v51 = vmul.f32 %v1525_v20, %v583_v38  ;;  %v581_v16 = vadd.f32 -1.4531521, %v577_v39  ;;  %v580_v54 = vmul.f32 1.0614054, %v1529_v48 }
 0x329   :  { %v591_v58 = vadd.f32 1.4214138, %v587_v51  ;;  %v1531_v52 = vpop.eup %1530  ;;  %v585_v60 = vmul.f32 %v1527_v37, %v581_v16  ;;  %v584_v18 = vadd.f32 -1.4531521, %v580_v54 }
 0x32a   :  { %v578_v63 = vmul.f32 1.0614054, %v1531_v52  ;;  %v1533_v54 = vpop.eup %1532 }
 0x32b   :  { %v595_v62 = vmul.f32 %v1525_v20, %v591_v58  ;;  %v589_v56 = vadd.f32 1.4214138, %v585_v60  ;;  %v588_v1 = vmul.f32 %v1529_v48, %v584_v18 }
 0x32c   :  { %v582_v10 = vadd.f32 -1.4531521, %v578_v63  ;;  %v1535_v63 = vpop.eup %1534 }
 0x32d   :  { %v599_v3 = vadd.f32 -0.28449672, %v595_v62  ;;  %v593_v15 = vmul.f32 %v1527_v37, %v589_v56  ;;  %v592_v24 = vadd.f32 1.4214138, %v588_v1 }
 0x32e   :  { %v586_v61 = vmul.f32 %v1531_v52, %v582_v10  ;;  %v1537_v10 = vpop.eup %1536 }
 0x32f   :  { %v603_v25 = vmul.f32 %v1525_v20, %v599_v3  ;;  %v597_v29 = vadd.f32 -0.28449672, %v593_v15  ;;  %v596_v31 = vmul.f32 %v1529_v48, %v592_v24 }
 0x330   :  { %v590_v38 = vadd.f32 1.4214138, %v586_v61 }
 0x331   :  { %v607_v33 = vadd.f32 0.2548296, %v603_v25  ;;  %v601_v39 = vmul.f32 %v1527_v37, %v597_v29  ;;  %v600_v44 = vadd.f32 -0.28449672, %v596_v31  ;;  %v1539_v29 = vpop.eup %1538 }
 0x332   :  { %v594_v16 = vmul.f32 %v1531_v52, %v590_v38 }
 0x333   :  { %v611_v51 = vmul.f32 %v1525_v20, %v607_v33  ;;  %v605_v11 = vadd.f32 0.2548296, %v601_v39  ;;  %v604_v58 = vmul.f32 %v1529_v48, %v600_v44 }
 0x334   :  { %v598_v55 = vadd.f32 -0.28449672, %v594_v16 }
 0x335   :  { %v631_v60 = vmul.f32 %v1533_v54, %v611_v51  ;;  %v609_v18 = vmul.f32 %v1527_v37, %v605_v11  ;;  %v608_v62 = vadd.f32 0.2548296, %v604_v58  ;;  %v551_v54 = vmul.f32 0.5, %v1957_v46 }
 0x336   :  { %v602_v1 = vmul.f32 %v1531_v52, %v598_v55  ;;  %v552_v11 = vmul.f32 0.5, %v1972_v8  ;;  %v2000_v8 = vld [vmem:[%s2126_s13] sm:$0xf] }
 0x337   :  { %v635_v56 = vsub.f32 1.0, %v631_v60  ;;  %v629_v3 = vmul.f32 %v1535_v63, %v609_v18  ;;  %v612_v0 = vmul.f32 %v1529_v48, %v608_v62  ;;  %v550_v62 = vmul.f32 0.5, %v1981_v53 }
 0x338   :  { %v606_v24 = vadd.f32 0.2548296, %v602_v1 }
 0x339   :  { %v643_v15 = vsub.f32 0.0, %v635_v56  ;;  %v633_v25 = vsub.f32 1.0, %v629_v3  ;;  %v632_v61 = vmul.f32 %v1537_v10, %v612_v0 }
 0x33a   :  { %v610_v20 = vmul.f32 %v1531_v52, %v606_v24 }
 0x33b   :  { %v647_v31 = vsel %vm639_vm5, %v643_v15, %v635_v56  ;;  %v641_v33 = vsub.f32 0.0, %v633_v25  ;;  %v636_v38 = vsub.f32 1.0, %v632_v61 }
 0x33c   :  { %v630_v39 = vmul.f32 %v1539_v29, %v610_v20  ;;  %v651_v44 = vadd.f32 1.0, %v647_v31 }
 0x33d   :  { %v644_v37 = vsub.f32 0.0, %v636_v38  ;;  %v645_v51 = vsel %vm637_vm6, %v641_v33, %v633_v25 }
 0x33e   :  { %v634_v48 = vsub.f32 1.0, %v630_v39  ;;  %v655_v58 = vmul.f32 %v651_v44, %v551_v54  ;;  %v649_v60 = vadd.f32 1.0, %v645_v51 }
 0x33f   :  { %v648_v16 = vsel %vm640_vm7, %v644_v37, %v636_v38 }
 0x340   :  { %v652_v49 = vadd.f32 1.0, %v648_v16  ;;  %v642_v52 = vsub.f32 0.0, %v634_v48  ;;  %v653_v1 = vmul.f32 %v649_v60, %v549_v21 }
 0x342   :  { %v656_v55 = vmul.f32 %v652_v49, %v552_v11  ;;  %v646_v18 = vsel %vm638_vm8, %v642_v52, %v634_v48 }
 0x343   :  { %v650_v6 = vadd.f32 1.0, %v646_v18 }
 0x344   :  { %v658_v63 = vpack.c.bf16 %v656_v55, %v655_v58 }
 0x345   :  { %v654_v56 = vmul.f32 %v650_v6, %v550_v62 }
 0x346   :  { %1424 = vmatpush3.bf16.msra.mxu1 %v658_v63 }
 0x347   :  { %1425 = vmatprep.subr.bf16.mxu1 %v1560_v2  ;;  %v657_v46 = vpack.c.bf16 %v654_v56, %v653_v1 }
 0x34a   :  { %1426 = vmatpush3.bf16.msra.mxu1 %v657_v46 }
 0x34b   :  { %1450 = vmatprep.subr.mxu1 %v1560_v2 }
 0x34d   :  { %1428 = vmatmul.mubr.msk.bf16.vlgmr.msra.gmra.mxu1 %vm664_vm9, %v2000_v8 }
 0x34e   :  { %1451 = vmatpush3.msra.mxu1 %v1660_v5  ;;  %1466 = vmatprep.mubr.msk.f32.mxu1 %vm1561_vm0, %v1560_v2  ;;  %v2036_v5 = vpop.permute.xlu0 %661 }
 0x34f   :  { %1452 = vmatprep.subr.mxu1 %v1560_v2 }
 0x350   :  { %1453 = vmatpush3.msra.mxu1 %v1670_v7 }
 0x351   :  { %1454 = vmatprep.subr.mxu1 %v1560_v2 }
 0x352   :  { %1455 = vmatpush3.msra.mxu1 %v1686_v9 }
 0x353   :  { %1456 = vmatprep.subr.mxu1 %v1560_v2 }
 0x354   :  { %1457 = vmatpush3.msra.mxu1 %v1704_v12 }
 0x355   :  { %1458 = vmatprep.subr.mxu1 %v1560_v2 }
 0x356   :  { %1459 = vmatpush3.msra.mxu1 %v1717_v14 }
 0x357   :  { %1460 = vmatprep.subr.mxu1 %v1560_v2 }
 0x358   :  { %1461 = vmatpush3.msra.mxu1 %v1734_v17 }
 0x359   :  { %1462 = vmatprep.subr.mxu1 %v1560_v2 }
 0x35a   :  { %1463 = vmatpush3.msra.mxu1 %v1747_v19 }
 0x35b   :  { %1464 = vmatprep.subr.mxu1 %v1560_v2 }
 0x35c   :  { %1465 = vmatpush3.msra.mxu1 %v1766_v22 }
 0x35d   :  { %1467 = vmatmul.mubr.msk.f32.vlgmr.msra.gmra.mxu1 %vm94_vm1, %v1791_v26  ;;  %1482 = vmatprep.subr.mxu1 %v1560_v2  ;;  %v878_v26 = vmul.f32 %v1931_v59, %v1880_v41 }
 0x35e   :  { %1483 = vmatpush3.msra.mxu1 %v1801_v28  ;;  %1492 = vmatprep.mubr.msk.f32.mxu1 %vm1561_vm0, %v1560_v2  ;;  %v881_v28 = vmul.f32 %v1931_v59, %v1885_v42 }
 0x35f   :  { %1484 = vmatprep.subr.mxu1 %v1560_v2 }
 0x360   :  { %1485 = vmatpush3.msra.mxu1 %v1813_v30 }
 0x361   :  { %1486 = vmatprep.subr.mxu1 %v1560_v2 }
 0x362   :  { %1487 = vmatpush3.msra.mxu1 %v1837_v32 }
 0x363   :  { %1488 = vmatprep.subr.mxu1 %v1560_v2 }
 0x364   :  { %1489 = vmatpush3.msra.mxu1 %v1850_v34 }
 0x365   :  { %1490 = vmatprep.subr.mxu1 %v1560_v2 }
 0x366   :  { %1491 = vmatpush3.msra.mxu1 %v1861_v36 }
 0x40d   :  { %v702_v7 = vpop.f32.mrf.mxu1 }
 0x40e   :  { %v703_v9 = vadd.f32 %v702_v7, %v2036_v5 }
 0x40f   :  { %v1429_v12 = vpop.f32.mrf.mxu1 }
 0x410   :  { %v708_v14 = vadd.f32 %v703_v9, %v1780_v23 }
 0x411   :  { %v705_v17 = vpop.f32.mrf.mxu1 }
 0x412   :  { %709 = vst.msk [vmem:[%s2127_s15] sm:$0xff] %vm94_vm1, %v708_v14 }
 0x413   :  { %v1430_v19 = vpop.f32.mrf.mxu1 }
 0x41d   :  { %v874_v22 = vpop.f32.mrf.mxu1 }
 0x41e   :  { %v879_v30 = vmul.f32 %v874_v22, %v1885_v42  ;;  %v882_v32 = vmul.f32 %v874_v22, %v1880_v41 }
 0x41f   :  { %v1468_v34 = vpop.f32.mrf.mxu1 }
 0x420   :  { %v880_v23 = vsub.f32 %v878_v26, %v879_v30  ;;  %v883_v36 = vadd.f32 %v882_v32, %v881_v28 }
 0x422   :  { %1480 = vmatmul.mubr.msk.f32.vlgmr.msra.gmra.mxu0 %vm278_vm2, %v883_v36  ;;  %1493 = vmatmul.mubr.msk.f32.vlgmr.msra.gmra.mxu1 %vm278_vm2, %v880_v23 }
 0x423   :  { %1497 = vmatprep.mubr.msk.bf16.mxu0 %vm489_vm3, %v1926_v4 }
 0x4e2   :  { %v953_v50 = vpop.f32.mrf.mxu0  ;;  %v1026_v53 = vpop.f32.mrf.mxu1 }
 0x4e3   :  { %v1027_v57 = vadd.f32 %v1026_v53, %v953_v50 }
 0x4e4   :  { %v1481_v3 = vpop.f32.mrf.mxu0  ;;  %v1494_v0 = vpop.f32.mrf.mxu1 }
 0x4e5   :  { %v1030_v59 = vsel %vm94_vm1, %v1027_v57, 0.0 }
 0x4e6   :  { %v1031_v42 = vrot.slane %v1030_v59, 4 }
 0x4e8   :  { %v1032_v10 = vadd.f32 %v1031_v42, %v1030_v59 }
 0x4ea   :  { %v1033_v41 = vrot.slane %v1032_v10, 2 }
 0x4ec   :  { %v1034_v15 = vadd.f32 %v1033_v41, %v1032_v10 }
 0x4ee   :  { %v1035_v24 = vrot.slane %v1034_v15, 1 }
 0x4f0   :  { %v1036_v25 = vadd.f32 %v1035_v24, %v1034_v15 }
 0x4f2   :  { %v1037_v61 = vmul.f32 0.125, %v1036_v25 }
 0x4f4   :  { %v1038_v20 = vsub.f32 %v1027_v57, %v1037_v61 }
 0x4f6   :  { %v1039_v29 = vmul.f32 %v1038_v20, %v1038_v20 }
 0x4f8   :  { %v1040_v31 = vsel %vm94_vm1, %v1039_v29, 0.0 }
 0x4f9   :  { %v1041_v33 = vrot.slane %v1040_v31, 4 }
 0x4fb   :  { %v1042_v4 = vadd.f32 %v1041_v33, %v1040_v31 }
 0x4fd   :  { %v1043_v38 = vrot.slane %v1042_v4, 2 }
 0x4ff   :  { %v1044_v39 = vadd.f32 %v1043_v38, %v1042_v4 }
 0x501   :  { %v1045_v37 = vrot.slane %v1044_v39, 1 }
 0x503   :  { %v1046_v44 = vadd.f32 %v1045_v37, %v1044_v39 }
 0x505   :  { %v1047_v48 = vmul.f32 0.125, %v1046_v44 }
 0x507   :  { %v1048_v51 = vadd.f32 1e-05, %v1047_v48 }
 0x509   :  { %1540 = vrsqrt.f32 %v1048_v51 }
 0x516   :  { %v1541_v16 = vpop.eup %1540 }
 0x517   :  { %v1050_v54 = vmul.f32 %v1541_v16, %v1038_v20 }
 0x519   :  { %v1051_v11 = vmul.f32 %v1050_v54, %v1934_v27 }
 0x51b   :  { %v1052_v49 = vadd.f32 %v1051_v11, %v1937_v35 }
 0x51d   :  { %v1053_v52 = vpack.c.bf16 %v1052_v49, %v1052_v49 }
 0x51f   :  { %1510 = vmatprep.subr.msk.bf16.mxu0 %vm496_vm4, %v1053_v52  ;;  %v1055_v58 = vsel %vm496_vm4, %v1053_v52, 0 }
 0x520   :  { %1496 = vmatpush3.bf16.msra.mxu0 %v1055_v58 }
 0x521   :  { %1501 = vmatprep.subr.bf16.mxu0 %v1560_v2 }
 0x523   :  { %1498 = vmatmul.mubr.msk.bf16.vlgmr.msra.gmra.mxu0 %vm489_vm3, %v1945_v40 }
 0x524   :  { %1505 = vmatprep.mubr.msk.bf16.mxu0 %vm1561_vm0, %v1560_v2 }
 0x5e3   :  { %v1499_v60 = vpop.f32.mrf.mxu0 }
 0x5e4   :  { %v2066_v55 = vadd.f32 %v1499_v60, %v1952_v43 }
 0x5e5   :  { %v1091_v27 = vpop.f32.mrf.mxu0 }
 0x5e6   :  { %v2069_v35 = vmul.f32 0.70710677, %v2066_v55  ;;  %v2072_v18 = vadd.f32 %v1091_v27, %v1959_v47 }
 0x5e7   :  { %v1500_v62 = vpop.f32.mrf.mxu0 }
 0x5e8   :  { %v1116_v6 = vand.u32 2147483647, %v2069_v35  ;;  %v2076_v21 = vmul.f32 0.70710677, %v2072_v18  ;;  %v2079_v40 = vadd.f32 %v1500_v62, %v1954_v45  ;;  %vm1196_vm10 = vcmp.lt.f32.partialorder %v2069_v35, 0.0 }
 0x5e9   :  { %v1094_v63 = vpop.f32.mrf.mxu0 }
 0x5ea   :  { %v1120_v56 = vmul.f32 0.3275911, %v1116_v6  ;;  %v1114_v43 = vand.u32 2147483647, %v2076_v21  ;;  %v2083_v1 = vmul.f32 0.70710677, %v2079_v40  ;;  %v2086_v46 = vadd.f32 %v1094_v63, %v1974_v13 }
 0x5eb   :  { %v1172_v28 = vsub.f32 0.0, %v1116_v6  ;;  %vm1194_vm11 = vcmp.lt.f32.partialorder %v2076_v21, 0.0 }
 0x5ec   :  { %v1124_v47 = vadd.f32 1.0, %v1120_v56  ;;  %v1118_v7 = vmul.f32 0.3275911, %v1114_v43  ;;  %v1117_v9 = vand.u32 2147483647, %v2083_v1  ;;  %v1170_v13 = vsub.f32 0.0, %v1114_v43 }
 0x5ed   :  { %v2090_v12 = vmul.f32 0.70710677, %v2086_v46  ;;  %v1176_v30 = vmul.f32 %v1172_v28, %v1116_v6  ;;  %vm1197_vm12 = vcmp.lt.f32.partialorder %v2083_v1, 0.0  ;;  %v1106_v1 = vmul.f32 0.5, %v2072_v18 }
 0x5ee   :  { %1542 = vrcp.f32 %v1124_v47  ;;  %v1122_v45 = vadd.f32 1.0, %v1118_v7  ;;  %v1121_v14 = vmul.f32 0.3275911, %v1117_v9  ;;  %v1173_v32 = vsub.f32 0.0, %v1117_v9 }
 0x5ef   :  { %v1115_v17 = vand.u32 2147483647, %v2090_v12  ;;  %v1174_v23 = vmul.f32 %v1170_v13, %v1114_v43  ;;  %v1182_v50 = vmul.f32 1.442695, %v1176_v30  ;;  %vm1195_vm13 = vcmp.lt.f32.partialorder %v2090_v12, 0.0 }
 0x5f0   :  { %1544 = vrcp.f32 %v1122_v45  ;;  %v1125_v19 = vadd.f32 1.0, %v1121_v14  ;;  %v1177_v57 = vmul.f32 %v1173_v32, %v1117_v9 }
 0x5f1   :  { %v1119_v22 = vmul.f32 0.3275911, %v1115_v17  ;;  %v1171_v53 = vsub.f32 0.0, %v1115_v17  ;;  %v1178_v42 = vmul.f32 1.442695, %v1174_v23 }
 0x5f2   :  { %1546 = vrcp.f32 %v1125_v19  ;;  %v1184_v61 = vmul.f32 1.442695, %v1177_v57 }
 0x5f3   :  { %v1123_v26 = vadd.f32 1.0, %v1119_v22  ;;  %v1175_v15 = vmul.f32 %v1171_v53, %v1115_v17 }
 0x5f5   :  { %1548 = vrcp.f32 %v1123_v26  ;;  %v1180_v39 = vmul.f32 1.442695, %v1175_v15 }
 0x5f6   :  { %1550 = vpow2.f32 %v1182_v50 }
 0x5f7   :  { %1552 = vpow2.f32 %v1178_v42 }
 0x5f8   :  { %1554 = vpow2.f32 %v1184_v61  ;;  %v1109_v61 = vmul.f32 0.5, %v2079_v40 }
 0x5f9   :  { %1556 = vpow2.f32 %v1180_v39 }
 0x5fb   :  { %v1543_v34 = vpop.eup %1542 }
 0x5fc   :  { %v1136_v36 = vmul.f32 1.0614054, %v1543_v34 }
 0x5fd   :  { %v1545_v3 = vpop.eup %1544 }
 0x5fe   :  { %v1140_v0 = vadd.f32 -1.4531521, %v1136_v36  ;;  %v1134_v59 = vmul.f32 1.0614054, %v1545_v3 }
 0x5ff   :  { %v1547_v10 = vpop.eup %1546 }
 0x600   :  { %v1144_v41 = vmul.f32 %v1543_v34, %v1140_v0  ;;  %v1138_v24 = vadd.f32 -1.4531521, %v1134_v59  ;;  %v1137_v25 = vmul.f32 1.0614054, %v1547_v10 }
 0x602   :  { %v1148_v20 = vadd.f32 1.4214138, %v1144_v41  ;;  %v1549_v29 = vpop.eup %1548  ;;  %v1142_v31 = vmul.f32 %v1545_v3, %v1138_v24  ;;  %v1141_v33 = vadd.f32 -1.4531521, %v1137_v25  ;;  %v1108_v25 = vmul.f32 0.5, %v2066_v55 }
 0x603   :  { %v1135_v38 = vmul.f32 1.0614054, %v1549_v29  ;;  %v1551_v43 = vpop.eup %1550 }
 0x604   :  { %v1152_v4 = vmul.f32 %v1543_v34, %v1148_v20  ;;  %v1146_v37 = vadd.f32 1.4214138, %v1142_v31  ;;  %v1145_v44 = vmul.f32 %v1547_v10, %v1141_v33  ;;  %v1553_v19 = vpop.eup %1552 }
 0x605   :  { %v1139_v51 = vadd.f32 -1.4531521, %v1135_v38  ;;  %v1555_v30 = vpop.eup %1554  ;;  %v1107_v38 = vmul.f32 0.5, %v2086_v46  ;;  %v1558_v46 = vld [vmem:[%s2118_s0 + $0x8] sm:$0xff] }
 0x606   :  { %v1156_v48 = vadd.f32 -0.28449672, %v1152_v4  ;;  %v1150_v16 = vmul.f32 %v1545_v3, %v1146_v37  ;;  %v1149_v54 = vadd.f32 1.4214138, %v1145_v44  ;;  %v1557_v53 = vpop.eup %1556 }
 0x607   :  { %v1143_v49 = vmul.f32 %v1549_v29, %v1139_v51 }
 0x608   :  { %v1160_v11 = vmul.f32 %v1543_v34, %v1156_v48  ;;  %v1154_v52 = vadd.f32 -0.28449672, %v1150_v16  ;;  %v1153_v58 = vmul.f32 %v1547_v10, %v1149_v54 }
 0x609   :  { %v1147_v27 = vadd.f32 1.4214138, %v1143_v49 }
 0x60a   :  { %v1164_v60 = vadd.f32 0.2548296, %v1160_v11  ;;  %v1158_v62 = vmul.f32 %v1545_v3, %v1154_v52  ;;  %v1157_v6 = vadd.f32 -0.28449672, %v1153_v58 }
 0x60b   :  { %v1151_v56 = vmul.f32 %v1549_v29, %v1147_v27 }
 0x60c   :  { %v1168_v63 = vmul.f32 %v1543_v34, %v1164_v60  ;;  %v1162_v47 = vadd.f32 0.2548296, %v1158_v62  ;;  %v1161_v7 = vmul.f32 %v1547_v10, %v1157_v6 }
 0x60d   :  { %v1155_v45 = vadd.f32 -0.28449672, %v1151_v56 }
 0x60e   :  { %v1188_v9 = vmul.f32 %v1551_v43, %v1168_v63  ;;  %v1166_v14 = vmul.f32 %v1545_v3, %v1162_v47  ;;  %v1165_v17 = vadd.f32 0.2548296, %v1161_v7 }
 0x60f   :  { %v1159_v26 = vmul.f32 %v1549_v29, %v1155_v45 }
 0x610   :  { %v1192_v22 = vsub.f32 1.0, %v1188_v9  ;;  %v1186_v28 = vmul.f32 %v1553_v19, %v1166_v14  ;;  %v1169_v13 = vmul.f32 %v1547_v10, %v1165_v17 }
 0x611   :  { %v1163_v23 = vadd.f32 0.2548296, %v1159_v26 }
 0x612   :  { %v1200_v32 = vsub.f32 0.0, %v1192_v22  ;;  %v1190_v36 = vsub.f32 1.0, %v1186_v28  ;;  %v1189_v50 = vmul.f32 %v1555_v30, %v1169_v13 }
 0x613   :  { %v1167_v34 = vmul.f32 %v1549_v29, %v1163_v23 }
 0x614   :  { %v1204_v57 = vsel %vm1196_vm10, %v1200_v32, %v1192_v22  ;;  %v1198_v0 = vsub.f32 0.0, %v1190_v36  ;;  %v1193_v59 = vsub.f32 1.0, %v1189_v50 }
 0x615   :  { %v1187_v42 = vmul.f32 %v1557_v53, %v1167_v34  ;;  %v1208_v41 = vadd.f32 1.0, %v1204_v57 }
 0x616   :  { %v1201_v3 = vsub.f32 0.0, %v1193_v59  ;;  %v1202_v15 = vsel %vm1194_vm11, %v1198_v0, %v1190_v36 }
 0x617   :  { %v1191_v10 = vsub.f32 1.0, %v1187_v42  ;;  %v1212_v29 = vmul.f32 %v1208_v41, %v1108_v25  ;;  %v1206_v31 = vadd.f32 1.0, %v1202_v15 }
 0x618   :  { %v1205_v24 = vsel %vm1197_vm12, %v1201_v3, %v1193_v59 }
 0x619   :  { %v1209_v35 = vadd.f32 1.0, %v1205_v24  ;;  %v1199_v20 = vsub.f32 0.0, %v1191_v10  ;;  %v1210_v44 = vmul.f32 %v1206_v31, %v1106_v1 }
 0x61b   :  { %v1213_v33 = vmul.f32 %v1209_v35, %v1109_v61  ;;  %v1203_v4 = vsel %vm1195_vm13, %v1199_v20, %v1191_v10 }
 0x61c   :  { %v1207_v21 = vadd.f32 1.0, %v1203_v4 }
 0x61d   :  { %v1215_v39 = vpack.c.bf16 %v1213_v33, %v1212_v29 }
 0x61e   :  { %v1211_v37 = vmul.f32 %v1207_v21, %v1107_v38 }
 0x61f   :  { %1502 = vmatpush3.bf16.msra.mxu0 %v1215_v39 }
 0x620   :  { %1503 = vmatprep.subr.bf16.mxu0 %v1560_v2  ;;  %v1214_v55 = vpack.c.bf16 %v1211_v37, %v1210_v44 }
 0x623   :  { %1504 = vmatpush3.bf16.msra.mxu0 %v1214_v55 }
 0x626   :  { %1506 = vmatmul.mubr.msk.bf16.vlgmr.msra.gmra.mxu0 %vm664_vm9, %v2000_v8 }
 0x6e6   :  { %v1250_v40 = vpop.f32.mrf.mxu0 }
 0x6e7   :  { %v1251_v12 = vadd.f32 %v1250_v40, %v2036_v5 }
 0x6e8   :  { %v1507_v48 = vpop.f32.mrf.mxu0 }
 0x6e9   :  { %v1256_v18 = vadd.f32 %v1558_v46, %v1251_v12 }
 0x6ea   :  { %v1253_v51 = vpop.f32.mrf.mxu0 }
 0x6eb   :  { %1280 = vst.msk [vmem:[%s2127_s15 + $0x8] sm:$0xff] %vm94_vm1, %v1256_v18 }
 0x6ec   :  { %v1508_v2 = vpop.f32.mrf.mxu0 }

</bundles_post_ra>
